<compile_context>
chip_gen: v7x
topology: tpu7x:2x2x1
jax: 0.10.0
libtpu: 0.0.40
codegen_flags: <defaults>
</compile_context>

<pallas_src>
import functools

import numpy as np
import jax
import jax.numpy as jnp
from jax.experimental import pallas as pl
from jax.experimental.pallas import tpu as pltpu


# ----------------------------------------------------------------------------- #
# Generic fused 3x3 replicate-padded conv kernel (NHWC, channels in lanes).
# ----------------------------------------------------------------------------- #
def _conv3x3_kernel(x_ref, w_ref, b_ref, o_ref, *, relu):
    # x_ref: (Hp, Wp, Cin)  padded input slab for one (scale, batch) element
    # w_ref: (9, Cin, Cout) packed taps, k = kh*3 + kw
    # b_ref: (1, Cout)
    # o_ref: (H, W, Cout)
    H, W, Cout = o_ref.shape
    Cin = x_ref.shape[-1]

    acc = jnp.zeros((H * W, Cout), dtype=jnp.float32)
    for k in range(9):                       # static unroll: 9 MXU matmuls
        dh, dw = divmod(k, 3)
        win = x_ref[dh:dh + H, dw:dw + W, :]               # (H, W, Cin)
        acc = acc + jnp.dot(win.reshape(H * W, Cin), w_ref[k],
                            preferred_element_type=jnp.float32)
    acc = acc + b_ref[...].astype(jnp.float32)             # (1, Cout) broadcast
    if relu:
        acc = jnp.maximum(acc, 0.0)
    o_ref[...] = acc.reshape(H, W, Cout).astype(o_ref.dtype)


def conv3x3_grouped(x, w, b, *, relu):
    """Grouped 3x3 conv with replicate padding.

    x: (S, N, H, W, Cin)   -- S independent "scales", each with its own weights
    w: (S, 9, Cin, Cout)   -- packed taps (k = kh*3 + kw)
    b: (S, 1, Cout)
    returns (S, N, H, W, Cout)
    """
    S, N, H, W, Cin = x.shape
    Cout = w.shape[-1]
    xp = jnp.pad(x, ((0, 0), (0, 0), (1, 1), (1, 1), (0, 0)), mode="edge")
    Hp, Wp = H + 2, W + 2

    kernel = functools.partial(_conv3x3_kernel, relu=relu)

    grid_spec = pltpu.PrefetchScalarGridSpec(
        num_scalar_prefetch=0,
        grid=(S, N),                         # N innermost -> weight block reused
        in_specs=[
            pl.BlockSpec((None, None, Hp, Wp, Cin), lambda s, n: (s, n, 0, 0, 0)),
            pl.BlockSpec((None, 9, Cin, Cout), lambda s, n: (s, 0, 0, 0)),
            pl.BlockSpec((None, 1, Cout), lambda s, n: (s, 0, 0)),
        ],
        out_specs=pl.BlockSpec((None, None, H, W, Cout),
                               lambda s, n: (s, n, 0, 0, 0)),
    )

    return pl.pallas_call(
        kernel,
        grid_spec=grid_spec,
        out_shape=jax.ShapeDtypeStruct((S, N, H, W, Cout), x.dtype),
        compiler_params=pltpu.CompilerParams(
            dimension_semantics=("parallel", "parallel")),
    )(xp, w, b)


# ----------------------------------------------------------------------------- #
# Weight packing helpers.
# ----------------------------------------------------------------------------- #
def _pack_w(w_oihw):
    """PyTorch (Cout, Cin, 3, 3) -> (9, Cin, Cout), tap index k = kh*3 + kw."""
    cout, cin = w_oihw.shape[0], w_oihw.shape[1]
    return jnp.transpose(w_oihw, (2, 3, 1, 0)).reshape(9, cin, cout)


def _conv_init(key, cout, cin, ksize=3):
    kw, kb = jax.random.split(key)
    fan_in = cin * ksize * ksize
    bound = 1.0 / np.sqrt(fan_in)
    w = jax.random.uniform(kw, (cout, cin, ksize, ksize), jnp.float32, -bound, bound)
    bias = jax.random.uniform(kb, (cout,), jnp.float32, -bound, bound)
    return w, bias


# ----------------------------------------------------------------------------- #
# Module port.
# ----------------------------------------------------------------------------- #
class NeighboringCrossConvolutionsPallas:
    """JAX/Pallas port of NeighboringCrossConvolutions (3x3 convs, replicate pad)."""

    # output i <- list of (input scale j, conv name, scale factor)
    _CONTRIBS = {
        0: [(0, "conv_scale0_1", 1.0), (1, "topview_down0", 0.25),
            (2, "topview_down1", 0.25), (3, "topview_down2", 0.25),
            (4, "topview_down3", 0.25)],
        1: [(1, "conv_scale1_1", 1.0), (0, "topview_up0", 1.0 / 3.0),
            (2, "cross_conv21", 1.0 / 3.0), (4, "cross_conv41", 1.0 / 3.0)],
        2: [(2, "conv_scale2_1", 1.0), (0, "topview_up1", 1.0 / 3.0),
            (1, "cross_conv12", 1.0 / 3.0), (3, "cross_conv32", 1.0 / 3.0)],
        3: [(3, "conv_scale3_1", 1.0), (0, "topview_up2", 1.0 / 3.0),
            (2, "cross_conv23", 1.0 / 3.0), (4, "cross_conv43", 1.0 / 3.0)],
        4: [(4, "conv_scale4_1", 1.0), (0, "topview_up3", 1.0 / 3.0),
            (1, "cross_conv14", 1.0 / 3.0), (3, "cross_conv34", 1.0 / 3.0)],
    }

    def __init__(self, in_channels, channels, channels_hidden=512,
                 kernel_size=3, use_gamma=True, key=None):
        assert kernel_size == 3, "only the 3x3 configuration is implemented"
        if not channels_hidden:
            channels_hidden = channels
        self.in_channels = in_channels
        self.channels = channels
        self.channels_hidden = channels_hidden
        self.use_gamma = use_gamma
        if key is None:
            key = jax.random.PRNGKey(0)

        conv_defs = []
        for i in range(5):
            conv_defs.append((f"conv_scale{i}_0", channels_hidden, in_channels))
            conv_defs.append((f"conv_scale{i}_1", channels, channels_hidden))
        for i in range(4):
            conv_defs.append((f"topview_up{i}", channels, channels_hidden))
            conv_defs.append((f"topview_down{i}", channels, channels_hidden))
        for name in ("12", "14", "21", "23", "32", "34", "41", "43"):
            conv_defs.append((f"cross_conv{name}", channels, channels_hidden))

        self.params = {}
        keys = jax.random.split(key, len(conv_defs))
        for k, (name, cout, cin) in zip(keys, conv_defs):
            w, b = _conv_init(k, cout, cin)
            self.params[f"{name}_w"] = w
            self.params[f"{name}_b"] = b
        for i in range(5):                       # matches PyTorch: gamma init to 0
            self.params[f"gamma{i}"] = jnp.zeros((), jnp.float32)

    def forward(self, x0, x1, x2, x3, x4):
        p = self.params
        Chid, C = self.channels_hidden, self.channels

        # ---- stage 1: conv_scale{i}_0 + ReLU, all 5 scales in one pallas_call ----
        xs_nhwc = jnp.stack(
            [jnp.transpose(x, (0, 2, 3, 1)) for x in (x0, x1, x2, x3, x4)], axis=0)
        w1 = jnp.stack([_pack_w(p[f"conv_scale{i}_0_w"]) for i in range(5)], axis=0)
        b1 = jnp.stack([p[f"conv_scale{i}_0_b"][None, :] for i in range(5)], axis=0)
        y = conv3x3_grouped(xs_nhwc, w1, b1, relu=True)     # (5, N, H, W, Chid)

        # ---- stage 2: one fused conv over concat(y0..y4) ----
        # sum_j conv(y_j, W_ij) == conv(concat_j y_j, stacked W); scale factors,
        # biases and gamma_i are folded into the packed weight/bias blocks.
        ycat = jnp.concatenate([y[i] for i in range(5)], axis=-1)[None]  # (1,N,H,W,5*Chid)
        w2 = jnp.zeros((9, 5 * Chid, 5 * C), dtype=jnp.float32)
        b2 = jnp.zeros((5 * C,), dtype=jnp.float32)
        for i, contribs in self._CONTRIBS.items():
            gamma = p[f"gamma{i}"] if self.use_gamma else 1.0
            for (j, name, scale) in contribs:
                factor = scale * gamma
                w2 = w2.at[:, j * Chid:(j + 1) * Chid, i * C:(i + 1) * C].set(
                    _pack_w(p[f"{name}_w"]) * factor)
                b2 = b2.at[i * C:(i + 1) * C].add(p[f"{name}_b"] * factor)

        out = conv3x3_grouped(ycat, w2[None], b2[None, None, :], relu=False)
        out = out[0]                                        # (N, H, W, 5*C)
        outs = tuple(jnp.transpose(out[..., i * C:(i + 1) * C], (0, 3, 1, 2))
                     for i in range(5))
        return outs


# ----------------------------------------------------------------------------- #
# Pure-JAX reference (mirrors the PyTorch forward op-for-op).
# ----------------------------------------------------------------------------- #
def _ref_conv3x3(x, w, b):
    xp = jnp.pad(x, ((0, 0), (0, 0), (1, 1), (1, 1)), mode="edge")
    y = jax.lax.conv_general_dilated(
        xp, w, window_strides=(1, 1), padding="VALID",
        dimension_numbers=("NCHW", "OIHW", "NCHW"),
        precision=jax.lax.Precision.HIGHEST)
    return y + b[None, :, None, None]


def reference_forward(params, xs, use_gamma=True):
    p = params
    y = [jnp.maximum(_ref_conv3x3(xs[i], p[f"conv_scale{i}_0_w"],
                                  p[f"conv_scale{i}_0_b"]), 0.0) for i in range(5)]
    out = [_ref_conv3x3(y[i], p[f"conv_scale{i}_1_w"], p[f"conv_scale{i}_1_b"])
           for i in range(5)]
    tup = [_ref_conv3x3(y[0], p[f"topview_up{i}_w"], p[f"topview_up{i}_b"])
           for i in range(4)]
    tdn = [_ref_conv3x3(y[i + 1], p[f"topview_down{i}_w"], p[f"topview_down{i}_b"])
           for i in range(4)]

    def cc(tag, inp):
        return _ref_conv3x3(inp, p[f"cross_conv{tag}_w"], p[f"cross_conv{tag}_b"])

    y21, y41 = cc("21", y[2]), cc("41", y[4])
    y12, y32 = cc("12", y[1]), cc("32", y[3])
    y23, y43 = cc("23", y[2]), cc("43", y[4])
    y14, y34 = cc("14", y[1]), cc("34", y[3])

    o0 = out[0] + 0.25 * (tdn[0] + tdn[1] + tdn[2] + tdn[3])
    o1 = out[1] + (1.0 / 3.0) * (tup[0] + y21 + y41)
    o2 = out[2] + (1.0 / 3.0) * (tup[1] + y12 + y32)
    o3 = out[3] + (1.0 / 3.0) * (tup[2] + y23 + y43)
    o4 = out[4] + (1.0 / 3.0) * (tup[3] + y14 + y34)
    outs = [o0, o1, o2, o3, o4]
    if use_gamma:
        outs = [outs[i] * p[f"gamma{i}"] for i in range(5)]
    return outs


# ----------------------------------------------------------------------------- #
if __name__ == "__main__":
    key = jax.random.PRNGKey(0)
    batch, in_channels, channels, channels_hidden = 2, 4, 8, 32
    H = W = 16

    k_mod, k_x, k_g = jax.random.split(key, 3)
    module = NeighboringCrossConvolutionsPallas(
        in_channels, channels, channels_hidden=channels_hidden,
        use_gamma=True, key=k_mod)

    # gammas default to zero (as in PyTorch init); set them to nonzero values so
    # the correctness check actually exercises the compute path.
    gvals = jax.random.normal(k_g, (5,), dtype=jnp.float32)
    for i in range(5):
        module.params[f"gamma{i}"] = gvals[i]

    xkeys = jax.random.split(k_x, 5)
    xs = [jax.random.normal(k, (batch, in_channels, H, W), dtype=jnp.float32)
          for k in xkeys]

    outs = module.forward(*xs)
    outs = [jax.block_until_ready(o) for o in outs]

    refs = reference_forward(module.params, xs, use_gamma=True)
    for o, r in zip(outs, refs):
        np.testing.assert_allclose(np.asarray(o), np.asarray(r),
                                   rtol=2e-3, atol=2e-3)

    print("KERNEL_OK")
</pallas_src>

<mosaic_0001>
module attributes {stable_mosaic.version = 11 : i64} {
  func.func @_conv3x3_kernel(%arg0: i32, %arg1: i32, %arg2: memref<1x1x18x18x4xf32, #tpu.memory_space<vmem>>, %arg3: memref<1x9x4x32xf32, #tpu.memory_space<vmem>>, %arg4: memref<1x1x32xf32, #tpu.memory_space<vmem>>, %arg5: memref<1x1x16x16x32xf32, #tpu.memory_space<vmem>>) attributes {dimension_semantics = [#tpu.dimension_semantics<parallel>, #tpu.dimension_semantics<parallel>], iteration_bounds = array<i64: 5, 2>, scalar_prefetch = 0 : i64, scratch_operands = 0 : i64, tpu.core_type = #tpu.core_type<tc>, window_params = [{transform_indices = @transform_0, window_bounds = array<i64: 1, 1, 18, 18, 4>}, {transform_indices = @transform_1, window_bounds = array<i64: 1, 9, 4, 32>}, {transform_indices = @transform_2, window_bounds = array<i64: 1, 1, 32>}, {transform_indices = @transform_3, window_bounds = array<i64: 1, 1, 16, 16, 32>}]} {
    %cst = arith.constant 0.000000e+00 : f32
    %0 = vector.broadcast %cst : f32 to vector<256x32xf32>
    %c0 = arith.constant 0 : index
    %c0_0 = arith.constant 0 : index
    %c0_1 = arith.constant 0 : index
    %c0_2 = arith.constant 0 : index
    %c0_3 = arith.constant 0 : index
    %1 = vector.load %arg2[%c0, %c0_0, %c0_1, %c0_2, %c0_3] : memref<1x1x18x18x4xf32, #tpu.memory_space<vmem>>, vector<1x1x16x16x4xf32>
    %2 = vector.shape_cast %1 : vector<1x1x16x16x4xf32> to vector<16x16x4xf32>
    %3 = vector.shape_cast %2 : vector<16x16x4xf32> to vector<256x4xf32>
    %c0_4 = arith.constant 0 : index
    %c0_5 = arith.constant 0 : index
    %c0_6 = arith.constant 0 : index
    %c0_7 = arith.constant 0 : index
    %4 = vector.load %arg3[%c0_4, %c0_5, %c0_6, %c0_7] : memref<1x9x4x32xf32, #tpu.memory_space<vmem>>, vector<1x1x4x32xf32>
    %5 = vector.shape_cast %4 : vector<1x1x4x32xf32> to vector<4x32xf32>
    %cst_8 = arith.constant dense<0.000000e+00> : vector<256x32xf32>
    %6 = tpu.matmul %3, %5, %cst_8 {dimension_numbers = #tpu.dot_dimension_numbers<[1], [0], [0], [1], [0, 0, 1, 1], [], []>} : vector<256x4xf32>, vector<4x32xf32>, vector<256x32xf32> -> vector<256x32xf32>
    %7 = arith.addf %0, %6 : vector<256x32xf32>
    %c0_9 = arith.constant 0 : index
    %c0_10 = arith.constant 0 : index
    %c0_11 = arith.constant 0 : index
    %c1 = arith.constant 1 : index
    %c0_12 = arith.constant 0 : index
    %8 = vector.load %arg2[%c0_9, %c0_10, %c0_11, %c1, %c0_12] : memref<1x1x18x18x4xf32, #tpu.memory_space<vmem>>, vector<1x1x16x16x4xf32>
    %9 = vector.shape_cast %8 : vector<1x1x16x16x4xf32> to vector<16x16x4xf32>
    %10 = vector.shape_cast %9 : vector<16x16x4xf32> to vector<256x4xf32>
    %c0_13 = arith.constant 0 : index
    %c1_14 = arith.constant 1 : index
    %c0_15 = arith.constant 0 : index
    %c0_16 = arith.constant 0 : index
    %11 = vector.load %arg3[%c0_13, %c1_14, %c0_15, %c0_16] : memref<1x9x4x32xf32, #tpu.memory_space<vmem>>, vector<1x1x4x32xf32>
    %12 = vector.shape_cast %11 : vector<1x1x4x32xf32> to vector<4x32xf32>
    %cst_17 = arith.constant dense<0.000000e+00> : vector<256x32xf32>
    %13 = tpu.matmul %10, %12, %cst_17 {dimension_numbers = #tpu.dot_dimension_numbers<[1], [0], [0], [1], [0, 0, 1, 1], [], []>} : vector<256x4xf32>, vector<4x32xf32>, vector<256x32xf32> -> vector<256x32xf32>
    %14 = arith.addf %7, %13 : vector<256x32xf32>
    %c0_18 = arith.constant 0 : index
    %c0_19 = arith.constant 0 : index
    %c0_20 = arith.constant 0 : index
    %c2 = arith.constant 2 : index
    %c0_21 = arith.constant 0 : index
    %15 = vector.load %arg2[%c0_18, %c0_19, %c0_20, %c2, %c0_21] : memref<1x1x18x18x4xf32, #tpu.memory_space<vmem>>, vector<1x1x16x16x4xf32>
    %16 = vector.shape_cast %15 : vector<1x1x16x16x4xf32> to vector<16x16x4xf32>
    %17 = vector.shape_cast %16 : vector<16x16x4xf32> to vector<256x4xf32>
    %c0_22 = arith.constant 0 : index
    %c2_23 = arith.constant 2 : index
    %c0_24 = arith.constant 0 : index
    %c0_25 = arith.constant 0 : index
    %18 = vector.load %arg3[%c0_22, %c2_23, %c0_24, %c0_25] : memref<1x9x4x32xf32, #tpu.memory_space<vmem>>, vector<1x1x4x32xf32>
    %19 = vector.shape_cast %18 : vector<1x1x4x32xf32> to vector<4x32xf32>
    %cst_26 = arith.constant dense<0.000000e+00> : vector<256x32xf32>
    %20 = tpu.matmul %17, %19, %cst_26 {dimension_numbers = #tpu.dot_dimension_numbers<[1], [0], [0], [1], [0, 0, 1, 1], [], []>} : vector<256x4xf32>, vector<4x32xf32>, vector<256x32xf32> -> vector<256x32xf32>
    %21 = arith.addf %14, %20 : vector<256x32xf32>
    %c0_27 = arith.constant 0 : index
    %c0_28 = arith.constant 0 : index
    %c1_29 = arith.constant 1 : index
    %c0_30 = arith.constant 0 : index
    %c0_31 = arith.constant 0 : index
    %22 = vector.load %arg2[%c0_27, %c0_28, %c1_29, %c0_30, %c0_31] : memref<1x1x18x18x4xf32, #tpu.memory_space<vmem>>, vector<1x1x16x16x4xf32>
    %23 = vector.shape_cast %22 : vector<1x1x16x16x4xf32> to vector<16x16x4xf32>
    %24 = vector.shape_cast %23 : vector<16x16x4xf32> to vector<256x4xf32>
    %c0_32 = arith.constant 0 : index
    %c3 = arith.constant 3 : index
    %c0_33 = arith.constant 0 : index
    %c0_34 = arith.constant 0 : index
    %25 = vector.load %arg3[%c0_32, %c3, %c0_33, %c0_34] : memref<1x9x4x32xf32, #tpu.memory_space<vmem>>, vector<1x1x4x32xf32>
    %26 = vector.shape_cast %25 : vector<1x1x4x32xf32> to vector<4x32xf32>
    %cst_35 = arith.constant dense<0.000000e+00> : vector<256x32xf32>
    %27 = tpu.matmul %24, %26, %cst_35 {dimension_numbers = #tpu.dot_dimension_numbers<[1], [0], [0], [1], [0, 0, 1, 1], [], []>} : vector<256x4xf32>, vector<4x32xf32>, vector<256x32xf32> -> vector<256x32xf32>
    %28 = arith.addf %21, %27 : vector<256x32xf32>
    %c0_36 = arith.constant 0 : index
    %c0_37 = arith.constant 0 : index
    %c1_38 = arith.constant 1 : index
    %c1_39 = arith.constant 1 : index
    %c0_40 = arith.constant 0 : index
    %29 = vector.load %arg2[%c0_36, %c0_37, %c1_38, %c1_39, %c0_40] : memref<1x1x18x18x4xf32, #tpu.memory_space<vmem>>, vector<1x1x16x16x4xf32>
    %30 = vector.shape_cast %29 : vector<1x1x16x16x4xf32> to vector<16x16x4xf32>
    %31 = vector.shape_cast %30 : vector<16x16x4xf32> to vector<256x4xf32>
    %c0_41 = arith.constant 0 : index
    %c4 = arith.constant 4 : index
    %c0_42 = arith.constant 0 : index
    %c0_43 = arith.constant 0 : index
    %32 = vector.load %arg3[%c0_41, %c4, %c0_42, %c0_43] : memref<1x9x4x32xf32, #tpu.memory_space<vmem>>, vector<1x1x4x32xf32>
    %33 = vector.shape_cast %32 : vector<1x1x4x32xf32> to vector<4x32xf32>
    %cst_44 = arith.constant dense<0.000000e+00> : vector<256x32xf32>
    %34 = tpu.matmul %31, %33, %cst_44 {dimension_numbers = #tpu.dot_dimension_numbers<[1], [0], [0], [1], [0, 0, 1, 1], [], []>} : vector<256x4xf32>, vector<4x32xf32>, vector<256x32xf32> -> vector<256x32xf32>
    %35 = arith.addf %28, %34 : vector<256x32xf32>
    %c0_45 = arith.constant 0 : index
    %c0_46 = arith.constant 0 : index
    %c1_47 = arith.constant 1 : index
    %c2_48 = arith.constant 2 : index
    %c0_49 = arith.constant 0 : index
    %36 = vector.load %arg2[%c0_45, %c0_46, %c1_47, %c2_48, %c0_49] : memref<1x1x18x18x4xf32, #tpu.memory_space<vmem>>, vector<1x1x16x16x4xf32>
    %37 = vector.shape_cast %36 : vector<1x1x16x16x4xf32> to vector<16x16x4xf32>
    %38 = vector.shape_cast %37 : vector<16x16x4xf32> to vector<256x4xf32>
    %c0_50 = arith.constant 0 : index
    %c5 = arith.constant 5 : index
    %c0_51 = arith.constant 0 : index
    %c0_52 = arith.constant 0 : index
    %39 = vector.load %arg3[%c0_50, %c5, %c0_51, %c0_52] : memref<1x9x4x32xf32, #tpu.memory_space<vmem>>, vector<1x1x4x32xf32>
    %40 = vector.shape_cast %39 : vector<1x1x4x32xf32> to vector<4x32xf32>
    %cst_53 = arith.constant dense<0.000000e+00> : vector<256x32xf32>
    %41 = tpu.matmul %38, %40, %cst_53 {dimension_numbers = #tpu.dot_dimension_numbers<[1], [0], [0], [1], [0, 0, 1, 1], [], []>} : vector<256x4xf32>, vector<4x32xf32>, vector<256x32xf32> -> vector<256x32xf32>
    %42 = arith.addf %35, %41 : vector<256x32xf32>
    %c0_54 = arith.constant 0 : index
    %c0_55 = arith.constant 0 : index
    %c2_56 = arith.constant 2 : index
    %c0_57 = arith.constant 0 : index
    %c0_58 = arith.constant 0 : index
    %43 = vector.load %arg2[%c0_54, %c0_55, %c2_56, %c0_57, %c0_58] : memref<1x1x18x18x4xf32, #tpu.memory_space<vmem>>, vector<1x1x16x16x4xf32>
    %44 = vector.shape_cast %43 : vector<1x1x16x16x4xf32> to vector<16x16x4xf32>
    %45 = vector.shape_cast %44 : vector<16x16x4xf32> to vector<256x4xf32>
    %c0_59 = arith.constant 0 : index
    %c6 = arith.constant 6 : index
    %c0_60 = arith.constant 0 : index
    %c0_61 = arith.constant 0 : index
    %46 = vector.load %arg3[%c0_59, %c6, %c0_60, %c0_61] : memref<1x9x4x32xf32, #tpu.memory_space<vmem>>, vector<1x1x4x32xf32>
    %47 = vector.shape_cast %46 : vector<1x1x4x32xf32> to vector<4x32xf32>
    %cst_62 = arith.constant dense<0.000000e+00> : vector<256x32xf32>
    %48 = tpu.matmul %45, %47, %cst_62 {dimension_numbers = #tpu.dot_dimension_numbers<[1], [0], [0], [1], [0, 0, 1, 1], [], []>} : vector<256x4xf32>, vector<4x32xf32>, vector<256x32xf32> -> vector<256x32xf32>
    %49 = arith.addf %42, %48 : vector<256x32xf32>
    %c0_63 = arith.constant 0 : index
    %c0_64 = arith.constant 0 : index
    %c2_65 = arith.constant 2 : index
    %c1_66 = arith.constant 1 : index
    %c0_67 = arith.constant 0 : index
    %50 = vector.load %arg2[%c0_63, %c0_64, %c2_65, %c1_66, %c0_67] : memref<1x1x18x18x4xf32, #tpu.memory_space<vmem>>, vector<1x1x16x16x4xf32>
    %51 = vector.shape_cast %50 : vector<1x1x16x16x4xf32> to vector<16x16x4xf32>
    %52 = vector.shape_cast %51 : vector<16x16x4xf32> to vector<256x4xf32>
    %c0_68 = arith.constant 0 : index
    %c7 = arith.constant 7 : index
    %c0_69 = arith.constant 0 : index
    %c0_70 = arith.constant 0 : index
    %53 = vector.load %arg3[%c0_68, %c7, %c0_69, %c0_70] : memref<1x9x4x32xf32, #tpu.memory_space<vmem>>, vector<1x1x4x32xf32>
    %54 = vector.shape_cast %53 : vector<1x1x4x32xf32> to vector<4x32xf32>
    %cst_71 = arith.constant dense<0.000000e+00> : vector<256x32xf32>
    %55 = tpu.matmul %52, %54, %cst_71 {dimension_numbers = #tpu.dot_dimension_numbers<[1], [0], [0], [1], [0, 0, 1, 1], [], []>} : vector<256x4xf32>, vector<4x32xf32>, vector<256x32xf32> -> vector<256x32xf32>
    %56 = arith.addf %49, %55 : vector<256x32xf32>
    %c0_72 = arith.constant 0 : index
    %c0_73 = arith.constant 0 : index
    %c2_74 = arith.constant 2 : index
    %c2_75 = arith.constant 2 : index
    %c0_76 = arith.constant 0 : index
    %57 = vector.load %arg2[%c0_72, %c0_73, %c2_74, %c2_75, %c0_76] : memref<1x1x18x18x4xf32, #tpu.memory_space<vmem>>, vector<1x1x16x16x4xf32>
    %58 = vector.shape_cast %57 : vector<1x1x16x16x4xf32> to vector<16x16x4xf32>
    %59 = vector.shape_cast %58 : vector<16x16x4xf32> to vector<256x4xf32>
    %c0_77 = arith.constant 0 : index
    %c8 = arith.constant 8 : index
    %c0_78 = arith.constant 0 : index
    %c0_79 = arith.constant 0 : index
    %60 = vector.load %arg3[%c0_77, %c8, %c0_78, %c0_79] : memref<1x9x4x32xf32, #tpu.memory_space<vmem>>, vector<1x1x4x32xf32>
    %61 = vector.shape_cast %60 : vector<1x1x4x32xf32> to vector<4x32xf32>
    %cst_80 = arith.constant dense<0.000000e+00> : vector<256x32xf32>
    %62 = tpu.matmul %59, %61, %cst_80 {dimension_numbers = #tpu.dot_dimension_numbers<[1], [0], [0], [1], [0, 0, 1, 1], [], []>} : vector<256x4xf32>, vector<4x32xf32>, vector<256x32xf32> -> vector<256x32xf32>
    %63 = arith.addf %56, %62 : vector<256x32xf32>
    %c0_81 = arith.constant 0 : index
    %c0_82 = arith.constant 0 : index
    %c0_83 = arith.constant 0 : index
    %64 = vector.load %arg4[%c0_81, %c0_82, %c0_83] : memref<1x1x32xf32, #tpu.memory_space<vmem>>, vector<1x1x32xf32>
    %65 = vector.shape_cast %64 : vector<1x1x32xf32> to vector<1x32xf32>
    %66 = vector.broadcast %65 : vector<1x32xf32> to vector<256x32xf32>
    %67 = arith.addf %63, %66 : vector<256x32xf32>
    %cst_84 = arith.constant 0.000000e+00 : f32
    %68 = vector.broadcast %cst_84 : f32 to vector<256x32xf32>
    %69 = arith.maximumf %67, %68 : vector<256x32xf32>
    %70 = vector.shape_cast %69 : vector<256x32xf32> to vector<16x16x32xf32>
    %c0_85 = arith.constant 0 : index
    %c0_86 = arith.constant 0 : index
    %c0_87 = arith.constant 0 : index
    %c0_88 = arith.constant 0 : index
    %c0_89 = arith.constant 0 : index
    %71 = vector.load %arg5[%c0_85, %c0_86, %c0_87, %c0_88, %c0_89] : memref<1x1x16x16x32xf32, #tpu.memory_space<vmem>>, vector<1x1x16x16x32xf32>
    %72 = vector.shape_cast %71 : vector<1x1x16x16x32xf32> to vector<16x16x32xf32>
    %73 = vector.shape_cast %70 : vector<16x16x32xf32> to vector<1x1x16x16x32xf32>
    tpu.vector_store %arg5[%c0_85, %c0_86, %c0_87, %c0_88, %c0_89], %73 {strides = array<i32>} : memref<1x1x16x16x32xf32, #tpu.memory_space<vmem>>, vector<1x1x16x16x32xf32>,
    return
  }
  func.func @transform_0(%arg0: i32, %arg1: i32) -> (i32, i32, i32, i32, i32) {
    %c0_i32 = arith.constant 0 : i32
    %c0_i32_0 = arith.constant 0 : i32
    %c0_i32_1 = arith.constant 0 : i32
    %c0_i32_2 = arith.constant 0 : i32
    return %arg0, %arg1, %c0_i32, %c0_i32_0, %c0_i32_1 : i32, i32, i32, i32, i32
  }
  func.func @transform_1(%arg0: i32, %arg1: i32) -> (i32, i32, i32, i32) {
    %c0_i32 = arith.constant 0 : i32
    %c0_i32_0 = arith.constant 0 : i32
    %c0_i32_1 = arith.constant 0 : i32
    %c0_i32_2 = arith.constant 0 : i32
    return %arg0, %c0_i32, %c0_i32_0, %c0_i32_1 : i32, i32, i32, i32
  }
  func.func @transform_2(%arg0: i32, %arg1: i32) -> (i32, i32, i32) {
    %c0_i32 = arith.constant 0 : i32
    %c0_i32_0 = arith.constant 0 : i32
    %c0_i32_1 = arith.constant 0 : i32
    return %arg0, %c0_i32, %c0_i32_0 : i32, i32, i32
  }
  func.func @transform_3(%arg0: i32, %arg1: i32) -> (i32, i32, i32, i32, i32) {
    %c0_i32 = arith.constant 0 : i32
    %c0_i32_0 = arith.constant 0 : i32
    %c0_i32_1 = arith.constant 0 : i32
    %c0_i32_2 = arith.constant 0 : i32
    return %arg0, %arg1, %c0_i32, %c0_i32_0, %c0_i32_1 : i32, i32, i32, i32, i32
  }
}

</mosaic_0001>

<bundles_post_ra>
// kernel: tpu_custom_call.1
= control target key start
LH: loop header
LB: loop body
LE: loop exit
PB: predicated region body
PF: predicated region fallthrough
CT: control target
= control target key end

     0   :  { %8 = vsyncpa [#allocation3], 0  ;;  %s6797_s0 = inlined_call_operand.vmem [shape: f32[5,2,18,18,4], index: 0, kind: input, shape index: {}]   ;;  %s6798_s1 = inlined_call_operand.vmem [shape: f32[5,9,4,32], index: 1, kind: input, shape index: {}]   ;;  %s6799_s2 = inlined_call_operand.vmem [shape: f32[5,1,32], index: 2, kind: input, shape index: {}]   ;;  %s6800_s3 = inlined_call_operand.hbm [shape: f32[5,2,16,16,32], index: 3, kind: output, shape index: {}]  }
   0x1   :  { %10 = vsyncpa [#allocation3 + $0x1], 0  ;;  %s5618_s12 = smov 0   ;;  %s5620_s13 = smov 0  }
   0x2   :  { %s5622_s14 = smov 0   ;;  %s5624_s15 = smov 0  }
   0x3   :  { %s5626_s16 = smov 0   ;;  %s5628_s17 = smov 0  }
   0x4   :  { %s5630_s18 = smov 0   ;;  %s5632_s19 = smov 0  }
   0x5 LB: > { %s3906_s20 = sadd.s32 4294967295, %s5593_s19   ;;  %s3907_s21 = sadd.s32 4294967294, %s5593_s19   ;;  %s5593_s19 = sphi %s5632_s19, %s16_s19   ;;  %s5589_s18 = sphi %s5630_s18, %s6918_s18   ;;  %s5585_s17 = sphi %s5628_s17, %s6917_s17   ;;  %s5581_s16 = sphi %s5626_s16, %s6916_s16   ;;  %s5577_s15 = sphi %s5624_s15, %s6915_s15   ;;  %s5573_s14 = sphi %s5622_s14, %s6914_s14   ;;  %s5569_s13 = sphi %s5620_s13, %s6913_s13   ;;  %s5565_s12 = sphi %s5618_s12, %s6912_s12  }
   0x6   : > { %s25_s22 = sadd.s32 1, %s5585_s17  ;;  %s28_s23 = sadd.s32 1, %s5589_s18 }
   0x7   : > { %p26_p0 = scmp.ge.s32.totalorder %s25_s22, 2  ;;  %p127_p1 = scmp.ne.s32.totalorder %s5573_s14, %s5569_s13 }
   0x8   : > { %p128_p2 = scmp.eq.s32.totalorder %s3906_s20, 9  ;;  %p133_p5 = scmp.ne.s32.totalorder %s5569_s13, %s5565_s12 }
   0x9   : > { %s6920_s22 = smov (%p26_p0, %s25_s22), 0  ;;  %s6922_s23 = smov (!%p26_p0, %s28_s23), %s5589_s18 }
   0xa   : > { %s113_s24 = ssub.s32 %s5585_s17, %s6920_s22  ;;  %p5669_p3 = por %p128_p2, %p127_p1 }
   0xb   : > { %p30_p4 = scmp.ge.s32.totalorder %s6922_s23, 5  ;;  %p134_p6 = scmp.eq.s32.totalorder %s3907_s21, 9 }
   0xc   : > { %p3910_p7 = scmp.ge.s32.totalorder %s5593_s19, 1  ;;  %p178_p9 = scmp.lt.s32.totalorder %s5593_s19, 11 }
   0xd   : > { %s6924_s23 = smov (%p30_p4, %s6922_s23), 0  ;;  %p5678_p8 = por %p134_p6, %p133_p5 }
   0xe   : > { %s112_s27 = ssub.s32 %s5589_s18, %s6924_s23  ;;  %s117_s28 = sadd.s32 1, %s5573_s14 }
   0xf   : > { %s114_s29 = sor.u32 %s113_s24, %s112_s27  ;;  %p179_p10 = pnand %p3910_p7, %p178_p9 }
  0x10   : > { %p115_p11 = scmp.eq.s32.totalorder %s114_s29, 0 }
  0x11   : > { %182 = sbr.rel (%p179_p10) target bundleno = 556 (0x22c), region = 32 }
  0x12   : > { %s5687_s30 = scalar_select %p115_p11, %s5573_s14, %s117_s28  }
  0x18   : > { %p214_p12 = scmp.lt.s32.totalorder %s5581_s16, 4  ;;  %p216_p13 = scmp.lt.s32.totalorder %s5577_s15, 1  ;;  %vm395_vm0 = vcmask 1043456   ;;  %vm298_vm1 = vcmask 31744   ;;  %vm3751_vm2 = vcmask 261120  }
  0x19   : > { %s5595_s29 = smov [#allocation2]  }
  0x1a   : > { %s5692_s4 = scalar_select %p214_p12, %s5581_s16, 4 }
  0x1b   : > { %s217_s5 = scalar_select %p216_p13, %s5577_s15, 1 }
  0x1c   : > { %s5424_s6 = smul.u32 108, %s5692_s4 }
  0x1d   : > { %s5423_s7 = smul.u32 54, %s217_s5  ;;  %s5503_s5 = sshll.u32 %s5595_s29, 4  ;;  %s5504_s5 = int_to_ptr.vmem [resolvable:$false] %s5503_s5 }
  0x1e   : > { %s5425_s8 = smul.u32 36, %s5692_s4 }
  0x1f   : > { %s220_s9 = sadd.s32 %s5424_s6, %s5423_s7  ;;  %s230_s6 = scalar_lea.vmem %s6799_s2, %s5692_s4 }
  0x20   : > { %s3912_s10 = sshll.u32 %s220_s9, 3  ;;  %s5700_s21 = scalar_lea.vmem %s6798_s1, %s5425_s8 }
  0x21   : > { %s5705_s28 = scalar_lea.vmem %s6797_s0, %s3912_s10  ;;  %v3914_v0 = vld [vmem:[%s5700_s21 + $0x4] sm:$0xf]  ;;  %v5709_v1 = vld [vmem:[%s5700_s21 + $0x10] sm:$0xf]  ;;  %v263_v2 = vld [vmem:[%s5700_s21] sm:$0xf] }
  0x22   : > { %4715 = vmatprep.subr.msk.mxu1 %vm395_vm0, %v3914_v0  ;;  %4915 = vmatprep.subr.msk.mxu0 %vm395_vm0, %v5709_v1  ;;  %v264_v3 = vld [vmem:[%s5705_s28 + $0x1] sm:$0xff]  ;;  %v4081_v4 = vld [vmem:[%s5705_s28 + $0x19] sm:$0xff]  ;;  %v4179_v5 = vld [vmem:[%s5700_s21 + $0x14] sm:$0xf]  ;;  %s211_s7 = sand.u32 1, %s5569_s13   ;;  %s4413_s9 = sshll.u32 %s5577_s15, 5 }
  0x23   : > { %4716 = vmatpush3.msk.msra.mxu1 %vm395_vm0, %v3914_v0  ;;  %4916 = vmatpush3.msk.msra.mxu0 %vm395_vm0, %v5709_v1  ;;  %v265_v6 = vld [vmem:[%s5705_s28 + $0x9] sm:$0xff]  ;;  %v4082_v7 = vld [vmem:[%s5705_s28 + $0x21] sm:$0xff]  ;;  %v5728_v8 = vld [vmem:[%s5705_s28 + $0x31] sm:$0xff]  ;;  %s3911_s8 = sshll.u32 %s211_s7, 8  ;;  %s4414_s10 = sshll.u32 %s5581_s16, 6 }
  0x24   : > { %4717 = vmatprep.mubr.msk.f32.mxu1 %vm298_vm1, %v264_v3  ;;  %4765 = vmatprep.subr.msk.mxu1 %vm395_vm0, %v263_v2  ;;  %v5735_v9 = vld [vmem:[%s5705_s28 + $0x39] sm:$0xff]  ;;  %v5741_v10 = vld [vmem:[%s5705_s28 + $0x49] sm:$0xff]  ;;  %v5753_v12 = vld [vmem:[%s5705_s28 + $0x51] sm:$0xff]  ;;  %s6633_s4 = scalar_lea.vmem [#allocation2], %s3911_s8  ;;  %s3797_s11 = sadd.s32 %s4414_s10, %s4413_s9 }
  0x25   : > { %4917 = vmatprep.mubr.msk.f32.mxu0 %vm298_vm1, %v4081_v4  ;;  %4965 = vmatprep.subr.msk.mxu0 %vm395_vm0, %v4179_v5  ;;  %v4245_v11 = vld [vmem:[%s5700_s21 + $0x18] sm:$0xf]  ;;  %v5756_v13 = vld [vmem:[%s5705_s28 + $0x61] sm:$0xff]  ;;  %v5767_v14 = vld [vmem:[%s5705_s28 + $0x69] sm:$0xff]  ;;  %s4415_s15 = sshll.u32 %s3797_s11, 7  ;;  %s3800_s16 = sshll.u32 %s6633_s4, 4  ;;  %s6737_s16 = int_to_ptr.vmem [resolvable:$true] %s3800_s16 }
  0x26   : > { %4718 = vmatmul.mubr.msk.f32.vlgmr.msra.gmra.mrb[0].mxu1 %vm298_vm1, %v265_v6  ;;  %4918 = vmatmul.mubr.msk.f32.vlgmr.msra.gmra.mrb[0].mxu0 %vm298_vm1, %v4082_v7  ;;  %v5770_v15 = vld [vmem:[%s5705_s28 + $0x79] sm:$0xff]  ;;  %v5781_v16 = vld [vmem:[%s5705_s28 + $0x81] sm:$0xff]  ;;  %v5787_v18 = vld [vmem:[%s5705_s28 + $0x91] sm:$0xff]  ;;  %s6735_s24 = scalar_lea.hbm %s6800_s3, %s4415_s15  ;;  %s6745_s27 = scalar_lea.sflag [#allocation3], %s211_s7 }
  0x27   : > { %4766 = vmatpush3.msk.msra.mxu1 %vm395_vm0, %v263_v2  ;;  %4966 = vmatpush3.msk.msra.mxu0 %vm395_vm0, %v4179_v5  ;;  %v5784_v17 = vld [vmem:[%s5700_s21 + $0x8] sm:$0xf]  ;;  %v5800_v19 = vld [vmem:[%s5705_s28 + $0x99] sm:$0xff]  ;;  %v5814_v21 = vld [vmem:[%s5705_s28 + $0xb1] sm:$0xff]  ;;  %p5506_p4 = scmp.lt.s32.totalorder %s6737_s16, %s5504_s5 }
  0x28   : > { %4720 = vmatprep.mubr.msk.f32.mxu1 %vm298_vm1, %v4081_v4  ;;  %4920 = vmatprep.mubr.msk.f32.mxu0 %vm298_vm1, %v5728_v8  ;;  %v5803_v20 = vld [vmem:[%s5705_s28 + $0xa9] sm:$0xff]  ;;  %v5817_v22 = vld [vmem:[%s5705_s28 + $0xc1] sm:$0xff]  ;;  %v5845_v26 = vld [vmem:[%s5705_s28 + $0xd9] sm:$0xff] }
  0x29   : > { %5015 = vmatprep.subr.msk.mxu0 %vm395_vm0, %v4245_v11  ;;  %4815 = vmatprep.subr.msk.mxu1 %vm395_vm0, %v5784_v17  ;;  %v5828_v23 = vld [vmem:[%s5705_s28 + $0xc9] sm:$0xff]  ;;  %v5831_v24 = vld [vmem:[%s5705_s28 + $0x1a] sm:$0xff]  ;;  %v5848_v27 = vld [vmem:[%s5705_s28 + $0x32] sm:$0xff] }
  0x2a   : > { %4721 = vmatmul.mubr.msk.f32.gmra.mrb[2].mxu1 %vm298_vm1, %v4082_v7  ;;  %4921 = vmatmul.mubr.msk.f32.gmra.mrb[2].mxu0 %vm298_vm1, %v5735_v9  ;;  %v5842_v25 = vld [vmem:[%s5705_s28 + $0x22] sm:$0xff]  ;;  %v5851_v28 = vld [vmem:[%s5700_s21 + $0x1c] sm:$0xf]  ;;  %v5869_v31 = vld [vmem:[%s5705_s28 + $0xf1] sm:$0xff] }
  0x2b   : > { %4723 = vmatprep.mubr.msk.f32.mxu1 %vm298_vm1, %v5728_v8  ;;  %4923 = vmatprep.mubr.msk.f32.mxu0 %vm298_vm1, %v5741_v10  ;;  %v5861_v29 = vld [vmem:[%s5705_s28 + $0xe1] sm:$0xff]  ;;  %6849 = vst [vmem:[#allocation6_spill] sm:$0xff] %v5869_v31  ;;  %v5872_v32 = vld [vmem:[%s5705_s28 + $0x4a] sm:$0xff]  ;;  %v5885_v33 = vld [vmem:[%s5705_s28 + $0xf9] sm:$0xff] }
  0x2c   : > { %6848 = vst [vmem:[#allocation5_spill] sm:$0xff] %v5861_v29  ;;  %v5864_v30 = vld [vmem:[%s5705_s28 + $0x3a] sm:$0xff]  ;;  %6850 = vst [vmem:[#allocation7_spill] sm:$0xff] %v5885_v33  ;;  %v5888_v34 = vld [vmem:[%s5705_s28 + $0x52] sm:$0xff] }
  0x2d   : > { %v5891_v35 = vld [vmem:[%s5705_s28 + $0x109] sm:$0xff]  ;;  %v5905_v37 = vld [vmem:[%s5705_s28 + $0x111] sm:$0xff]  ;;  %v5911_v39 = vld [vmem:[%s5705_s28 + $0x121] sm:$0xff] }
  0x2e   : > { %4724 = vmatmul.mubr.msk.f32.gmra.mrb[4].mxu1 %vm298_vm1, %v5735_v9  ;;  %4924 = vmatmul.mubr.msk.f32.gmra.mrb[4].mxu0 %vm298_vm1, %v5753_v12  ;;  %6851 = vst [vmem:[#allocation8_spill] sm:$0xff] %v5891_v35  ;;  %v5894_v36 = vld [vmem:[%s5705_s28 + $0x62] sm:$0xff]  ;;  %6852 = vst [vmem:[#allocation9_spill] sm:$0xff] %v5905_v37  ;;  %v5908_v38 = vld [vmem:[%s5705_s28 + $0x6a] sm:$0xff] }
  0x2f   : > { %4726 = vmatprep.mubr.msk.f32.mxu1 %vm298_vm1, %v5741_v10  ;;  %4926 = vmatprep.mubr.msk.f32.mxu0 %vm298_vm1, %v5756_v13  ;;  %6853 = vst [vmem:[#allocation10_spill] sm:$0xff] %v5911_v39  ;;  %v5914_v40 = vld [vmem:[%s5705_s28 + $0x7a] sm:$0xff]  ;;  %v5925_v41 = vld [vmem:[%s5705_s28 + $0x129] sm:$0xff]  ;;  %v5934_v44 = vld [vmem:[%s5705_s28 + $0x92] sm:$0xff] }
  0x30   : > { %6854 = vst [vmem:[#allocation11_spill] sm:$0xff] %v5925_v41  ;;  %v5928_v42 = vld [vmem:[%s5705_s28 + $0x82] sm:$0xff]  ;;  %v5931_v43 = vld [vmem:[%s5705_s28 + $0x139] sm:$0xff]  ;;  %v5951_v47 = vld [vmem:[%s5705_s28 + $0x151] sm:$0xff] }
  0x31   : > { %6855 = vst [vmem:[#allocation12_spill] sm:$0xff] %v5931_v43  ;;  %v5945_v45 = vld [vmem:[%s5705_s28 + $0x141] sm:$0xff]  ;;  %6857 = vst [vmem:[#allocation14_spill] sm:$0xff] %v5951_v47  ;;  %v5954_v48 = vld [vmem:[%s5705_s28 + $0xaa] sm:$0xff] }
  0x32   : > { %4727 = vmatmul.mubr.msk.f32.gmra.mrb[6].mxu1 %vm298_vm1, %v5753_v12  ;;  %4927 = vmatmul.mubr.msk.f32.gmra.mrb[6].mxu0 %vm298_vm1, %v5767_v14  ;;  %6856 = vst [vmem:[#allocation13_spill] sm:$0xff] %v5945_v45  ;;  %v5948_v46 = vld [vmem:[%s5705_s28 + $0x9a] sm:$0xff]  ;;  %v5968_v50 = vld [vmem:[%s5705_s28 + $0xb2] sm:$0xff]  ;;  %v5971_v51 = vld [vmem:[%s5705_s28 + $0x169] sm:$0xff] }
  0x33   : > { %4729 = vmatprep.mubr.msk.f32.mxu1 %vm298_vm1, %v5756_v13  ;;  %4929 = vmatprep.mubr.msk.f32.mxu0 %vm298_vm1, %v5770_v15  ;;  %v5965_v49 = vld [vmem:[%s5705_s28 + $0x159] sm:$0xff]  ;;  %6859 = vst [vmem:[#allocation16_spill] sm:$0xff] %v5971_v51  ;;  %v5974_v52 = vld [vmem:[%s5705_s28 + $0xc2] sm:$0xff]  ;;  %v5985_v53 = vld [vmem:[%s5705_s28 + $0x171] sm:$0xff] }
  0x34   : > { %6858 = vst [vmem:[#allocation15_spill] sm:$0xff] %v5965_v49  ;;  %6860 = vst [vmem:[#allocation17_spill] sm:$0xff] %v5985_v53  ;;  %v5988_v54 = vld [vmem:[%s5705_s28 + $0xca] sm:$0xff]  ;;  %v231_v55 = vld [vmem:[%s5705_s28] sm:$0xff] }
  0x35   : > { %v5992_v56 = vld [vmem:[%s5705_s28 + $0xda] sm:$0xff]  ;;  %v232_v57 = vld [vmem:[%s5705_s28 + $0x8] sm:$0xff]  ;;  %v6009_v60 = vld [vmem:[%s5705_s28 + $0xf2] sm:$0xff] }
  0x36   : > { %4730 = vmatmul.mubr.msk.f32.gmra.mrb[8].mxu1 %vm298_vm1, %v5767_v14  ;;  %4930 = vmatmul.mubr.msk.f32.gmra.mrb[8].mxu0 %vm298_vm1, %v5781_v16  ;;  %v6003_v58 = vld [vmem:[%s5705_s28 + $0xe2] sm:$0xff]  ;;  %v6006_v59 = vld [vmem:[%s5705_s28 + $0x18] sm:$0xff]  ;;  %v6012_v61 = vld [vmem:[%s5700_s21 + $0xc] sm:$0xf] }
  0x37   : > { %4732 = vmatprep.mubr.msk.f32.mxu1 %vm298_vm1, %v5770_v15  ;;  %4932 = vmatprep.mubr.msk.f32.mxu0 %vm298_vm1, %v5787_v18  ;;  %6861 = vst [vmem:[#allocation18_spill] sm:$0xff] %v6006_v59  ;;  %v6022_v62 = vld [vmem:[%s5705_s28 + $0x20] sm:$0xff]  ;;  %v6030_v0 = vld [vmem:[%s5705_s28 + $0x30] sm:$0xff]  ;;  %v6046_v3 = vld [vmem:[%s5705_s28 + $0x38] sm:$0xff] }
  0x38   : > { %6862 = vst [vmem:[#allocation19_spill] sm:$0xff] %v6022_v62  ;;  %v6025_v63 = vld [vmem:[%s5705_s28 + $0xfa] sm:$0xff]  ;;  %6863 = vst [vmem:[#allocation20_spill] sm:$0xff] %v6030_v0  ;;  %v6033_v2 = vld [vmem:[%s5705_s28 + $0x10a] sm:$0xff] }
  0x39   : > { %6864 = vst [vmem:[#allocation21_spill] sm:$0xff] %v6046_v3  ;;  %v6049_v4 = vld [vmem:[%s5705_s28 + $0x112] sm:$0xff]  ;;  %v6052_v5 = vld [vmem:[%s5705_s28 + $0x48] sm:$0xff] }
  0x3a   : > { %4733 = vmatmul.mubr.msk.f32.gmra.mrb[10].mxu1 %vm298_vm1, %v5781_v16  ;;  %4933 = vmatmul.mubr.msk.f32.gmra.mrb[10].mxu0 %vm298_vm1, %v5800_v19  ;;  %6865 = vst [vmem:[#allocation22_spill] sm:$0xff] %v6052_v5  ;;  %v6055_v6 = vld [vmem:[%s5705_s28 + $0x122] sm:$0xff]  ;;  %v6066_v7 = vld [vmem:[%s5705_s28 + $0x50] sm:$0xff] }
  0x3b   : > { %4735 = vmatprep.mubr.msk.f32.mxu1 %vm298_vm1, %v5787_v18  ;;  %4935 = vmatprep.mubr.msk.f32.mxu0 %vm298_vm1, %v5803_v20  ;;  %6866 = vst [vmem:[#allocation23_spill] sm:$0xff] %v6066_v7 }
  0x3e   : > { %4736 = vmatmul.mubr.msk.f32.gmra.mrb[12].mxu1 %vm298_vm1, %v5800_v19  ;;  %4936 = vmatmul.mubr.msk.f32.gmra.mrb[12].mxu0 %vm298_vm1, %v5814_v21 }
  0x3f   : > { %4738 = vmatprep.mubr.msk.f32.mxu1 %vm298_vm1, %v5803_v20  ;;  %4938 = vmatprep.mubr.msk.f32.mxu0 %vm298_vm1, %v5817_v22 }
  0x42   : > { %4739 = vmatmul.mubr.msk.f32.gmra.mrb[14].mxu1 %vm298_vm1, %v5814_v21  ;;  %4939 = vmatmul.mubr.msk.f32.gmra.mrb[14].mxu0 %vm298_vm1, %v5828_v23 }
  0x43   : > { %4741 = vmatprep.mubr.msk.f32.mxu1 %vm298_vm1, %v5817_v22  ;;  %4967 = vmatprep.mubr.msk.f32.mxu0 %vm298_vm1, %v5831_v24 }
  0x46   : > { %4742 = vmatmul.mubr.msk.f32.gmra.mrb[16].mxu1 %vm298_vm1, %v5828_v23  ;;  %4968 = vmatmul.mubr.msk.f32.vlgmr.msra.gmra.mrb[0].mxu0 %vm298_vm1, %v5842_v25 }
  0x47   : > { %5016 = vmatpush3.msk.msra.mxu0 %vm395_vm0, %v4245_v11  ;;  %4744 = vmatprep.mubr.msk.f32.mxu1 %vm298_vm1, %v5845_v26  ;;  %v6069_v11 = vld [vmem:[%s5705_s28 + $0x12a] sm:$0xff] }
  0x48   : > { %4970 = vmatprep.mubr.msk.f32.mxu0 %vm298_vm1, %v5848_v27  ;;  %5065 = vmatprep.subr.msk.mxu0 %vm395_vm0, %v5851_v28 }
  0x4a   : > { %4745 = vmatmul.mubr.msk.f32.gmra.mrb[18].mxu1 %vm298_vm1, %v5861_v29  ;;  %4971 = vmatmul.mubr.msk.f32.gmra.mrb[2].mxu0 %vm298_vm1, %v5864_v30  ;;  %v6166_v29 = vld [vmem:[%s5705_s28 + $0xd8] sm:$0xff] }
  0x4b   : > { %4747 = vmatprep.mubr.msk.f32.mxu1 %vm298_vm1, %v5869_v31  ;;  %4973 = vmatprep.mubr.msk.f32.mxu0 %vm298_vm1, %v5872_v32  ;;  %v6149_v31 = vld [vmem:[%s5705_s28 + $0x18a] sm:$0xff] }
  0x4c   : > { %6877 = vst [vmem:[#allocation34_spill] sm:$0xff] %v6149_v31 }
  0x4e   : > { %4748 = vmatmul.mubr.msk.f32.gmra.mrb[20].mxu1 %vm298_vm1, %v5885_v33  ;;  %4974 = vmatmul.mubr.msk.f32.gmra.mrb[4].mxu0 %vm298_vm1, %v5888_v34  ;;  %v6135_v33 = vld [vmem:[%s5705_s28 + $0x182] sm:$0xff] }
  0x4f   : > { %4750 = vmatprep.mubr.msk.f32.mxu1 %vm298_vm1, %v5891_v35  ;;  %4976 = vmatprep.mubr.msk.f32.mxu0 %vm298_vm1, %v5894_v36  ;;  %v6132_v35 = vld [vmem:[%s5705_s28 + $0xa8] sm:$0xff]  ;;  %6875 = vst [vmem:[#allocation32_spill] sm:$0xff] %v6135_v33 }
  0x50   : > { %6874 = vst [vmem:[#allocation31_spill] sm:$0xff] %v6132_v35 }
  0x52   : > { %4751 = vmatmul.mubr.msk.f32.gmra.mrb[22].mxu1 %vm298_vm1, %v5905_v37  ;;  %4977 = vmatmul.mubr.msk.f32.gmra.mrb[6].mxu0 %vm298_vm1, %v5908_v38  ;;  %v6129_v37 = vld [vmem:[%s5705_s28 + $0x172] sm:$0xff] }
  0x53   : > { %4753 = vmatprep.mubr.msk.f32.mxu1 %vm298_vm1, %v5911_v39  ;;  %4979 = vmatprep.mubr.msk.f32.mxu0 %vm298_vm1, %v5914_v40  ;;  %v6126_v39 = vld [vmem:[%s5705_s28 + $0x98] sm:$0xff]  ;;  %6873 = vst [vmem:[#allocation30_spill] sm:$0xff] %v6129_v37 }
  0x54   : > { %6872 = vst [vmem:[#allocation29_spill] sm:$0xff] %v6126_v39 }
  0x56   : > { %4754 = vmatmul.mubr.msk.f32.gmra.mrb[24].mxu1 %vm298_vm1, %v5925_v41  ;;  %4980 = vmatmul.mubr.msk.f32.gmra.mrb[8].mxu0 %vm298_vm1, %v5928_v42  ;;  %v6115_v41 = vld [vmem:[%s5705_s28 + $0x16a] sm:$0xff] }
  0x57   : > { %4756 = vmatprep.mubr.msk.f32.mxu1 %vm298_vm1, %v5931_v43  ;;  %4982 = vmatprep.mubr.msk.f32.mxu0 %vm298_vm1, %v5934_v44  ;;  %v6112_v43 = vld [vmem:[%s5705_s28 + $0x90] sm:$0xff] }
  0x58   : > { %6871 = vst [vmem:[#allocation28_spill] sm:$0xff] %v6112_v43 }
  0x5a   : > { %4757 = vmatmul.mubr.msk.f32.gmra.mrb[26].mxu1 %vm298_vm1, %v5945_v45  ;;  %4983 = vmatmul.mubr.msk.f32.gmra.mrb[10].mxu0 %vm298_vm1, %v5948_v46  ;;  %v6109_v45 = vld [vmem:[%s5705_s28 + $0x15a] sm:$0xff] }
  0x5b   : > { %4759 = vmatprep.mubr.msk.f32.mxu1 %vm298_vm1, %v5951_v47  ;;  %4985 = vmatprep.mubr.msk.f32.mxu0 %vm298_vm1, %v5954_v48  ;;  %v6106_v47 = vld [vmem:[%s5705_s28 + $0x80] sm:$0xff] }
  0x5c   : > { %6870 = vst [vmem:[#allocation27_spill] sm:$0xff] %v6106_v47 }
  0x5e   : > { %4760 = vmatmul.mubr.msk.f32.gmra.mrb[28].mxu1 %vm298_vm1, %v5965_v49  ;;  %4986 = vmatmul.mubr.msk.f32.gmra.mrb[12].mxu0 %vm298_vm1, %v5968_v50  ;;  %v6095_v49 = vld [vmem:[%s5705_s28 + $0x152] sm:$0xff] }
  0x5f   : > { %4762 = vmatprep.mubr.msk.f32.mxu1 %vm298_vm1, %v5971_v51  ;;  %4988 = vmatprep.mubr.msk.f32.mxu0 %vm298_vm1, %v5974_v52  ;;  %v6092_v51 = vld [vmem:[%s5705_s28 + $0x78] sm:$0xff] }
  0x60   : > { %6869 = vst [vmem:[#allocation26_spill] sm:$0xff] %v6092_v51 }
  0x62   : > { %4763 = vmatmul.mubr.msk.f32.gmra.mrb[30].mxu1 %vm298_vm1, %v5985_v53  ;;  %4989 = vmatmul.mubr.msk.f32.gmra.mrb[14].mxu0 %vm298_vm1, %v5988_v54  ;;  %v6089_v53 = vld [vmem:[%s5705_s28 + $0x142] sm:$0xff] }
  0x63   : > { %4767 = vmatprep.mubr.msk.f32.mxu1 %vm298_vm1, %v231_v55  ;;  %4991 = vmatprep.mubr.msk.f32.mxu0 %vm298_vm1, %v5992_v56  ;;  %v6075_v55 = vld [vmem:[%s5705_s28 + $0x13a] sm:$0xff] }
  0x66   : > { %4768 = vmatmul.mubr.msk.f32.vlgmr.msra.gmra.mrb[0].mxu1 %vm298_vm1, %v232_v57  ;;  %4992 = vmatmul.mubr.msk.f32.gmra.mrb[16].mxu0 %vm298_vm1, %v6003_v58  ;;  %v6086_v57 = vld [vmem:[%s5705_s28 + $0x68] sm:$0xff] }
  0x67   : > { %4816 = vmatpush3.msk.msra.mxu1 %vm395_vm0, %v5784_v17  ;;  %4770 = vmatprep.mubr.msk.f32.mxu1 %vm298_vm1, %v6006_v59  ;;  %v6072_v17 = vld [vmem:[%s5705_s28 + $0x60] sm:$0xff]  ;;  %6868 = vst [vmem:[#allocation25_spill] sm:$0xff] %v6086_v57 }
  0x68   : > { %4994 = vmatprep.mubr.msk.f32.mxu0 %vm298_vm1, %v6009_v60  ;;  %4865 = vmatprep.subr.msk.mxu1 %vm395_vm0, %v6012_v61  ;;  %6867 = vst [vmem:[#allocation24_spill] sm:$0xff] %v6072_v17  ;;  %v6152_v59 = vld [vmem:[%s5705_s28 + $0xc0] sm:$0xff] }
  0x6a   : > { %4771 = vmatmul.mubr.msk.f32.gmra.mrb[2].mxu1 %vm298_vm1, %v6022_v62  ;;  %4995 = vmatmul.mubr.msk.f32.gmra.mrb[18].mxu0 %vm298_vm1, %v6025_v63  ;;  %v6146_v62 = vld [vmem:[%s5705_s28 + $0xb0] sm:$0xff] }
  0x6b   : > { %4773 = vmatprep.mubr.msk.f32.mxu1 %vm298_vm1, %v6030_v0  ;;  %4997 = vmatprep.mubr.msk.f32.mxu0 %vm298_vm1, %v6033_v2  ;;  %6876 = vst [vmem:[#allocation33_spill] sm:$0xff] %v6146_v62 }
  0x6e   : > { %4774 = vmatmul.mubr.msk.f32.gmra.mrb[4].mxu1 %vm298_vm1, %v6046_v3  ;;  %4998 = vmatmul.mubr.msk.f32.gmra.mrb[20].mxu0 %vm298_vm1, %v6049_v4 }
  0x6f   : > { %4776 = vmatprep.mubr.msk.f32.mxu1 %vm298_vm1, %v6052_v5  ;;  %5000 = vmatprep.mubr.msk.f32.mxu0 %vm298_vm1, %v6055_v6 }
  0x72   : > { %4777 = vmatmul.mubr.msk.f32.gmra.mrb[6].mxu1 %vm298_vm1, %v6066_v7  ;;  %5001 = vmatmul.mubr.msk.f32.gmra.mrb[22].mxu0 %vm298_vm1, %v6069_v11 }
  0x73   : > { %4779 = vmatprep.mubr.msk.f32.mxu1 %vm298_vm1, %v6072_v17  ;;  %5003 = vmatprep.mubr.msk.f32.mxu0 %vm298_vm1, %v6075_v55 }
  0x76   : > { %4780 = vmatmul.mubr.msk.f32.gmra.mrb[8].mxu1 %vm298_vm1, %v6086_v57  ;;  %5004 = vmatmul.mubr.msk.f32.gmra.mrb[24].mxu0 %vm298_vm1, %v6089_v53 }
  0x77   : > { %4782 = vmatprep.mubr.msk.f32.mxu1 %vm298_vm1, %v6092_v51  ;;  %5006 = vmatprep.mubr.msk.f32.mxu0 %vm298_vm1, %v6095_v49 }
  0x7a   : > { %4783 = vmatmul.mubr.msk.f32.gmra.mrb[10].mxu1 %vm298_vm1, %v6106_v47  ;;  %5007 = vmatmul.mubr.msk.f32.gmra.mrb[26].mxu0 %vm298_vm1, %v6109_v45 }
  0x7b   : > { %4785 = vmatprep.mubr.msk.f32.mxu1 %vm298_vm1, %v6112_v43  ;;  %5009 = vmatprep.mubr.msk.f32.mxu0 %vm298_vm1, %v6115_v41 }
  0x7e   : > { %4786 = vmatmul.mubr.msk.f32.gmra.mrb[12].mxu1 %vm298_vm1, %v6126_v39  ;;  %5010 = vmatmul.mubr.msk.f32.gmra.mrb[28].mxu0 %vm298_vm1, %v6129_v37  ;;  %v6169_v37 = vld [vmem:[%s5700_s21 + $0x20] sm:$0xf] }
  0x7f   : > { %4788 = vmatprep.mubr.msk.f32.mxu1 %vm298_vm1, %v6132_v35  ;;  %5012 = vmatprep.mubr.msk.f32.mxu0 %vm298_vm1, %v6135_v33  ;;  %v6163_v33 = vld [vmem:[%s5705_s28 + $0xc8] sm:$0xff] }
  0x80   : > { %6878 = vst [vmem:[#allocation35_spill] sm:$0xff] %v6163_v33 }
  0x82   : > { %4789 = vmatmul.mubr.msk.f32.gmra.mrb[14].mxu1 %vm298_vm1, %v6146_v62  ;;  %5013 = vmatmul.mubr.msk.f32.gmra.mrb[30].mxu0 %vm298_vm1, %v6149_v31  ;;  %v6180_v31 = vld [vmem:[%s5705_s28 + $0xe0] sm:$0xff] }
  0x83   : > { %4791 = vmatprep.mubr.msk.f32.mxu1 %vm298_vm1, %v6152_v59  ;;  %5017 = vmatprep.mubr.msk.f32.mxu0 %vm298_vm1, %v6030_v0  ;;  %v6185_v0 = vld [vmem:[%s5705_s28 + $0xf0] sm:$0xff] }
  0x86   : > { %4792 = vmatmul.mubr.msk.f32.gmra.mrb[16].mxu1 %vm298_vm1, %v6163_v33  ;;  %5018 = vmatmul.mubr.msk.f32.vlgmr.msra.gmra.mrb[0].mxu0 %vm298_vm1, %v6046_v3  ;;  %v948_v3 = vld [vmem:[%s5705_s28 + $0x2] sm:$0xff] }
  0x87   : > { %5066 = vmatpush3.msk.msra.mxu0 %vm395_vm0, %v5851_v28  ;;  %4794 = vmatprep.mubr.msk.f32.mxu1 %vm298_vm1, %v6166_v29  ;;  %v6198_v28 = vld [vmem:[%s5705_s28 + $0xf8] sm:$0xff] }
  0x88   : > { %5020 = vmatprep.mubr.msk.f32.mxu0 %vm298_vm1, %v6052_v5  ;;  %5115 = vmatprep.subr.msk.mxu0 %vm395_vm0, %v6169_v37  ;;  %v6201_v5 = vld [vmem:[%s5705_s28 + $0x108] sm:$0xff] }
  0x8a   : > { %4795 = vmatmul.mubr.msk.f32.gmra.mrb[18].mxu1 %vm298_vm1, %v6180_v31  ;;  %5021 = vmatmul.mubr.msk.f32.gmra.mrb[2].mxu0 %vm298_vm1, %v6066_v7  ;;  %v6212_v7 = vld [vmem:[%s5705_s28 + $0x110] sm:$0xff] }
  0x8b   : > { %4797 = vmatprep.mubr.msk.f32.mxu1 %vm298_vm1, %v6185_v0  ;;  %5023 = vmatprep.mubr.msk.f32.mxu0 %vm298_vm1, %v6072_v17  ;;  %v6215_v17 = vld [vmem:[%s5705_s28 + $0x120] sm:$0xff] }
  0x8e   : > { %4798 = vmatmul.mubr.msk.f32.gmra.mrb[20].mxu1 %vm298_vm1, %v6198_v28  ;;  %5024 = vmatmul.mubr.msk.f32.gmra.mrb[4].mxu0 %vm298_vm1, %v6086_v57  ;;  %v6226_v57 = vld [vmem:[%s5705_s28 + $0x128] sm:$0xff] }
  0x8f   : > { %4800 = vmatprep.mubr.msk.f32.mxu1 %vm298_vm1, %v6201_v5  ;;  %5026 = vmatprep.mubr.msk.f32.mxu0 %vm298_vm1, %v6092_v51  ;;  %v6229_v51 = vld [vmem:[%s5705_s28 + $0x138] sm:$0xff] }
  0x92   : > { %4801 = vmatmul.mubr.msk.f32.gmra.mrb[22].mxu1 %vm298_vm1, %v6212_v7  ;;  %5027 = vmatmul.mubr.msk.f32.gmra.mrb[6].mxu0 %vm298_vm1, %v6106_v47  ;;  %v6240_v47 = vld [vmem:[%s5705_s28 + $0x140] sm:$0xff] }
  0x93   : > { %4803 = vmatprep.mubr.msk.f32.mxu1 %vm298_vm1, %v6215_v17  ;;  %5029 = vmatprep.mubr.msk.f32.mxu0 %vm298_vm1, %v6112_v43  ;;  %v6243_v43 = vld [vmem:[%s5705_s28 + $0x150] sm:$0xff] }
  0x96   : > { %4804 = vmatmul.mubr.msk.f32.gmra.mrb[24].mxu1 %vm298_vm1, %v6226_v57  ;;  %5030 = vmatmul.mubr.msk.f32.gmra.mrb[8].mxu0 %vm298_vm1, %v6126_v39  ;;  %v6254_v39 = vld [vmem:[%s5705_s28 + $0x158] sm:$0xff] }
  0x97   : > { %4806 = vmatprep.mubr.msk.f32.mxu1 %vm298_vm1, %v6229_v51  ;;  %5032 = vmatprep.mubr.msk.f32.mxu0 %vm298_vm1, %v6132_v35  ;;  %v6257_v35 = vld [vmem:[%s5705_s28 + $0x168] sm:$0xff] }
  0x9a   : > { %4807 = vmatmul.mubr.msk.f32.gmra.mrb[26].mxu1 %vm298_vm1, %v6240_v47  ;;  %5033 = vmatmul.mubr.msk.f32.gmra.mrb[10].mxu0 %vm298_vm1, %v6146_v62  ;;  %v6268_v62 = vld [vmem:[%s5705_s28 + $0x170] sm:$0xff] }
  0x9b   : > { %4809 = vmatprep.mubr.msk.f32.mxu1 %vm298_vm1, %v6243_v43  ;;  %5035 = vmatprep.mubr.msk.f32.mxu0 %vm298_vm1, %v6152_v59 }
  0x9e   : > { %4810 = vmatmul.mubr.msk.f32.gmra.mrb[28].mxu1 %vm298_vm1, %v6254_v39  ;;  %5036 = vmatmul.mubr.msk.f32.gmra.mrb[12].mxu0 %vm298_vm1, %v6163_v33  ;;  %v949_v33 = vld [vmem:[%s5705_s28 + $0xa] sm:$0xff] }
  0x9f   : > { %4812 = vmatprep.mubr.msk.f32.mxu1 %vm298_vm1, %v6257_v35  ;;  %5038 = vmatprep.mubr.msk.f32.mxu0 %vm298_vm1, %v6166_v29 }
  0xa2   : > { %4813 = vmatmul.mubr.msk.f32.gmra.mrb[30].mxu1 %vm298_vm1, %v6268_v62  ;;  %5039 = vmatmul.mubr.msk.f32.gmra.mrb[14].mxu0 %vm298_vm1, %v6180_v31 }
  0xa3   : > { %4817 = vmatprep.mubr.msk.f32.mxu1 %vm298_vm1, %v948_v3  ;;  %5041 = vmatprep.mubr.msk.f32.mxu0 %vm298_vm1, %v6185_v0  ;;  %v6895_v3 = vld [vmem:[#allocation25_spill] sm:$0xff] }
  0xa6   : > { %4818 = vmatmul.mubr.msk.f32.vlgmr.msra.gmra.mrb[0].mxu1 %vm298_vm1, %v949_v33  ;;  %5042 = vmatmul.mubr.msk.f32.gmra.mrb[16].mxu0 %vm298_vm1, %v6198_v28  ;;  %v4243_v33 = vld [vmem:[%s5705_s28 + $0x198] sm:$0xff] }
  0xa7   : > { %4866 = vmatpush3.msk.msra.mxu1 %vm395_vm0, %v6012_v61  ;;  %4820 = vmatprep.mubr.msk.f32.mxu1 %vm298_vm1, %v5831_v24  ;;  %v6323_v24 = vld [vmem:[%s5705_s28 + $0x180] sm:$0xff] }
  0xa8   : > { %5044 = vmatprep.mubr.msk.f32.mxu0 %vm298_vm1, %v6201_v5  ;;  %5165 = vmatprep.subr.msk.mxu1 %vm395_vm0, %v5709_v1  ;;  %v4244_v61 = vld [vmem:[%s5705_s28 + $0x1a0] sm:$0xff] }
  0xaa   : > { %4821 = vmatmul.mubr.msk.f32.gmra.mrb[2].mxu1 %vm298_vm1, %v5842_v25  ;;  %5045 = vmatmul.mubr.msk.f32.gmra.mrb[18].mxu0 %vm298_vm1, %v6212_v7  ;;  %v6334_v25 = vld [vmem:[%s5705_s28 + $0x188] sm:$0xff] }
  0xab   : > { %4823 = vmatprep.mubr.msk.f32.mxu1 %vm298_vm1, %v5848_v27  ;;  %5047 = vmatprep.mubr.msk.f32.mxu0 %vm298_vm1, %v6215_v17 }
  0xae   : > { %4824 = vmatmul.mubr.msk.f32.gmra.mrb[4].mxu1 %vm298_vm1, %v5864_v30  ;;  %5048 = vmatmul.mubr.msk.f32.gmra.mrb[20].mxu0 %vm298_vm1, %v6226_v57 }
  0xaf   : > { %4826 = vmatprep.mubr.msk.f32.mxu1 %vm298_vm1, %v5872_v32  ;;  %5050 = vmatprep.mubr.msk.f32.mxu0 %vm298_vm1, %v6229_v51 }
  0xb2   : > { %4827 = vmatmul.mubr.msk.f32.gmra.mrb[6].mxu1 %vm298_vm1, %v5888_v34  ;;  %5051 = vmatmul.mubr.msk.f32.gmra.mrb[22].mxu0 %vm298_vm1, %v6240_v47 }
  0xb3   : > { %4829 = vmatprep.mubr.msk.f32.mxu1 %vm298_vm1, %v5894_v36  ;;  %5053 = vmatprep.mubr.msk.f32.mxu0 %vm298_vm1, %v6243_v43 }
  0xb6   : > { %4830 = vmatmul.mubr.msk.f32.gmra.mrb[8].mxu1 %vm298_vm1, %v5908_v38  ;;  %5054 = vmatmul.mubr.msk.f32.gmra.mrb[24].mxu0 %vm298_vm1, %v6254_v39 }
  0xb7   : > { %4832 = vmatprep.mubr.msk.f32.mxu1 %vm298_vm1, %v5914_v40  ;;  %5056 = vmatprep.mubr.msk.f32.mxu0 %vm298_vm1, %v6257_v35 }
  0xba   : > { %4833 = vmatmul.mubr.msk.f32.gmra.mrb[10].mxu1 %vm298_vm1, %v5928_v42  ;;  %5057 = vmatmul.mubr.msk.f32.gmra.mrb[26].mxu0 %vm298_vm1, %v6268_v62 }
  0xbb   : > { %4835 = vmatprep.mubr.msk.f32.mxu1 %vm298_vm1, %v5934_v44  ;;  %5059 = vmatprep.mubr.msk.f32.mxu0 %vm298_vm1, %v6323_v24 }
  0xbe   : > { %4836 = vmatmul.mubr.msk.f32.gmra.mrb[12].mxu1 %vm298_vm1, %v5948_v46  ;;  %5060 = vmatmul.mubr.msk.f32.gmra.mrb[28].mxu0 %vm298_vm1, %v6334_v25 }
  0xbf   : > { %4838 = vmatprep.mubr.msk.f32.mxu1 %vm298_vm1, %v5954_v48  ;;  %5062 = vmatprep.mubr.msk.f32.mxu0 %vm298_vm1, %v4243_v33  ;;  %v6896_v33 = vld [vmem:[#allocation13_spill] sm:$0xff] }
  0xc2   : > { %4839 = vmatmul.mubr.msk.f32.gmra.mrb[14].mxu1 %vm298_vm1, %v5968_v50  ;;  %5063 = vmatmul.mubr.msk.f32.gmra.mrb[30].mxu0 %vm298_vm1, %v4244_v61  ;;  %v6897_v61 = vld [vmem:[#allocation26_spill] sm:$0xff] }
  0xc3   : > { %4841 = vmatprep.mubr.msk.f32.mxu1 %vm298_vm1, %v5974_v52  ;;  %5067 = vmatprep.mubr.msk.f32.mxu0 %vm298_vm1, %v5728_v8  ;;  %v6879_v8 = vld [vmem:[#allocation30_spill] sm:$0xff] }
  0xc6   : > { %4842 = vmatmul.mubr.msk.f32.gmra.mrb[16].mxu1 %vm298_vm1, %v5988_v54  ;;  %5068 = vmatmul.mubr.msk.f32.vlgmr.msra.gmra.mrb[0].mxu0 %vm298_vm1, %v5735_v9  ;;  %v6880_v9 = vld [vmem:[#allocation5_spill] sm:$0xff] }
  0xc7   : > { %5116 = vmatpush3.msk.msra.mxu0 %vm395_vm0, %v6169_v37  ;;  %4844 = vmatprep.mubr.msk.f32.mxu1 %vm298_vm1, %v5992_v56  ;;  %v6894_v37 = vld [vmem:[#allocation12_spill] sm:$0xff] }
  0xc8   : > { %5070 = vmatprep.mubr.msk.f32.mxu0 %vm298_vm1, %v5741_v10  ;;  %v6881_v10 = vld [vmem:[#allocation18_spill] sm:$0xff] }
  0xca   : > { %4845 = vmatmul.mubr.msk.f32.gmra.mrb[18].mxu1 %vm298_vm1, %v6003_v58  ;;  %5071 = vmatmul.mubr.msk.f32.gmra.mrb[2].mxu0 %vm298_vm1, %v5753_v12  ;;  %v6882_v12 = vld [vmem:[#allocation6_spill] sm:$0xff] }
  0xcb   : > { %4847 = vmatprep.mubr.msk.f32.mxu1 %vm298_vm1, %v6009_v60  ;;  %5073 = vmatprep.mubr.msk.f32.mxu0 %vm298_vm1, %v5756_v13  ;;  %v6883_v13 = vld [vmem:[#allocation19_spill] sm:$0xff] }
  0xce   : > { %4848 = vmatmul.mubr.msk.f32.gmra.mrb[20].mxu1 %vm298_vm1, %v6025_v63  ;;  %5074 = vmatmul.mubr.msk.f32.gmra.mrb[4].mxu0 %vm298_vm1, %v5767_v14  ;;  %v6884_v14 = vld [vmem:[#allocation7_spill] sm:$0xff] }
  0xcf   : > { %4850 = vmatprep.mubr.msk.f32.mxu1 %vm298_vm1, %v6033_v2  ;;  %5076 = vmatprep.mubr.msk.f32.mxu0 %vm298_vm1, %v5770_v15  ;;  %v6885_v15 = vld [vmem:[#allocation20_spill] sm:$0xff] }
  0xd2   : > { %4851 = vmatmul.mubr.msk.f32.gmra.mrb[22].mxu1 %vm298_vm1, %v6049_v4  ;;  %5077 = vmatmul.mubr.msk.f32.gmra.mrb[6].mxu0 %vm298_vm1, %v5781_v16  ;;  %v6886_v16 = vld [vmem:[#allocation8_spill] sm:$0xff] }
  0xd3   : > { %4853 = vmatprep.mubr.msk.f32.mxu1 %vm298_vm1, %v6055_v6  ;;  %5079 = vmatprep.mubr.msk.f32.mxu0 %vm298_vm1, %v5787_v18  ;;  %v6887_v18 = vld [vmem:[#allocation21_spill] sm:$0xff] }
  0xd6   : > { %4854 = vmatmul.mubr.msk.f32.gmra.mrb[24].mxu1 %vm298_vm1, %v6069_v11  ;;  %5080 = vmatmul.mubr.msk.f32.gmra.mrb[8].mxu0 %vm298_vm1, %v5800_v19  ;;  %v6888_v19 = vld [vmem:[#allocation9_spill] sm:$0xff] }
  0xd7   : > { %4856 = vmatprep.mubr.msk.f32.mxu1 %vm298_vm1, %v6075_v55  ;;  %5082 = vmatprep.mubr.msk.f32.mxu0 %vm298_vm1, %v5803_v20  ;;  %v6889_v20 = vld [vmem:[#allocation22_spill] sm:$0xff] }
  0xda   : > { %4857 = vmatmul.mubr.msk.f32.gmra.mrb[26].mxu1 %vm298_vm1, %v6089_v53  ;;  %5083 = vmatmul.mubr.msk.f32.gmra.mrb[10].mxu0 %vm298_vm1, %v5814_v21  ;;  %v6890_v21 = vld [vmem:[#allocation10_spill] sm:$0xff] }
  0xdb   : > { %4859 = vmatprep.mubr.msk.f32.mxu1 %vm298_vm1, %v6095_v49  ;;  %5085 = vmatprep.mubr.msk.f32.mxu0 %vm298_vm1, %v5817_v22  ;;  %v6892_v22 = vld [vmem:[#allocation11_spill] sm:$0xff] }
  0xde   : > { %4860 = vmatmul.mubr.msk.f32.gmra.mrb[28].mxu1 %vm298_vm1, %v6109_v45  ;;  %5086 = vmatmul.mubr.msk.f32.gmra.mrb[12].mxu0 %vm298_vm1, %v5828_v23  ;;  %v6893_v23 = vld [vmem:[#allocation24_spill] sm:$0xff] }
  0xdf   : > { %4862 = vmatprep.mubr.msk.f32.mxu1 %vm298_vm1, %v6115_v41  ;;  %5088 = vmatprep.mubr.msk.f32.mxu0 %vm298_vm1, %v5845_v26 }
  0xe2   : > { %4863 = vmatmul.mubr.msk.f32.gmra.mrb[30].mxu1 %vm298_vm1, %v6879_v8  ;;  %5089 = vmatmul.mubr.msk.f32.gmra.mrb[14].mxu0 %vm298_vm1, %v6880_v9  ;;  %v6906_v8 = vld [vmem:[#allocation33_spill] sm:$0xff] }
  0xe3   : > { %4867 = vmatprep.mubr.msk.f32.mxu1 %vm298_vm1, %v6881_v10  ;;  %5091 = vmatprep.mubr.msk.f32.mxu0 %vm298_vm1, %v6882_v12  ;;  %v6898_v10 = vld [vmem:[#allocation14_spill] sm:$0xff] }
  0xe6   : > { %4868 = vmatmul.mubr.msk.f32.vlgmr.msra.gmra.mrb[0].mxu1 %vm298_vm1, %v6883_v13  ;;  %5092 = vmatmul.mubr.msk.f32.gmra.mrb[16].mxu0 %vm298_vm1, %v6884_v14  ;;  %v6899_v13 = vld [vmem:[#allocation27_spill] sm:$0xff] }
  0xe7   : > { %5166 = vmatpush3.msk.msra.mxu1 %vm395_vm0, %v5709_v1  ;;  %4870 = vmatprep.mubr.msk.f32.mxu1 %vm298_vm1, %v6885_v15  ;;  %v6891_v1 = vld [vmem:[#allocation23_spill] sm:$0xff] }
  0xe8   : > { %5094 = vmatprep.mubr.msk.f32.mxu0 %vm298_vm1, %v6886_v16  ;;  %v6900_v15 = vld [vmem:[#allocation15_spill] sm:$0xff] }
  0xea   : > { %4871 = vmatmul.mubr.msk.f32.gmra.mrb[2].mxu1 %vm298_vm1, %v6887_v18  ;;  %5095 = vmatmul.mubr.msk.f32.gmra.mrb[18].mxu0 %vm298_vm1, %v6888_v19  ;;  %v6901_v18 = vld [vmem:[#allocation28_spill] sm:$0xff] }
  0xeb   : > { %4873 = vmatprep.mubr.msk.f32.mxu1 %vm298_vm1, %v6889_v20  ;;  %5097 = vmatprep.mubr.msk.f32.mxu0 %vm298_vm1, %v6890_v21  ;;  %v6902_v20 = vld [vmem:[#allocation16_spill] sm:$0xff] }
  0xee   : > { %4874 = vmatmul.mubr.msk.f32.gmra.mrb[4].mxu1 %vm298_vm1, %v6891_v1  ;;  %5098 = vmatmul.mubr.msk.f32.gmra.mrb[20].mxu0 %vm298_vm1, %v6892_v22  ;;  %v6461_v1 = vld [vmem:[%s5705_s28 + $0x181] sm:$0xff] }
  0xef   : > { %4876 = vmatprep.mubr.msk.f32.mxu1 %vm298_vm1, %v6893_v23  ;;  %5100 = vmatprep.mubr.msk.f32.mxu0 %vm298_vm1, %v6894_v37  ;;  %v6903_v23 = vld [vmem:[#allocation29_spill] sm:$0xff] }
  0xf2   : > { %4877 = vmatmul.mubr.msk.f32.gmra.mrb[6].mxu1 %vm298_vm1, %v6895_v3  ;;  %5101 = vmatmul.mubr.msk.f32.gmra.mrb[22].mxu0 %vm298_vm1, %v6896_v33  ;;  %v6904_v3 = vld [vmem:[#allocation17_spill] sm:$0xff] }
  0xf3   : > { %4879 = vmatprep.mubr.msk.f32.mxu1 %vm298_vm1, %v6897_v61  ;;  %5103 = vmatprep.mubr.msk.f32.mxu0 %vm298_vm1, %v6898_v10  ;;  %v6905_v61 = vld [vmem:[#allocation31_spill] sm:$0xff] }
  0xf6   : > { %4880 = vmatmul.mubr.msk.f32.gmra.mrb[8].mxu1 %vm298_vm1, %v6899_v13  ;;  %5104 = vmatmul.mubr.msk.f32.gmra.mrb[24].mxu0 %vm298_vm1, %v6900_v15  ;;  %v6472_v13 = vld [vmem:[%s5705_s28 + $0x189] sm:$0xff] }
  0xf7   : > { %4882 = vmatprep.mubr.msk.f32.mxu1 %vm298_vm1, %v6901_v18  ;;  %5106 = vmatprep.mubr.msk.f32.mxu0 %vm298_vm1, %v6902_v20  ;;  %v4309_v18 = vld [vmem:[%s5705_s28 + $0x199] sm:$0xff] }
  0xfa   : > { %4883 = vmatmul.mubr.msk.f32.gmra.mrb[10].mxu1 %vm298_vm1, %v6903_v23  ;;  %5107 = vmatmul.mubr.msk.f32.gmra.mrb[26].mxu0 %vm298_vm1, %v6904_v3  ;;  %v4310_v23 = vld [vmem:[%s5705_s28 + $0x1a1] sm:$0xff]  ;;  %v6907_v3 = vld [vmem:[#allocation35_spill] sm:$0xff] }
  0xfb   : > { %4885 = vmatprep.mubr.msk.f32.mxu1 %vm298_vm1, %v6905_v61  ;;  %5109 = vmatprep.mubr.msk.f32.mxu0 %vm298_vm1, %v6461_v1 }
  0xfe   : > { %4886 = vmatmul.mubr.msk.f32.gmra.mrb[12].mxu1 %vm298_vm1, %v6906_v8  ;;  %5110 = vmatmul.mubr.msk.f32.gmra.mrb[28].mxu0 %vm298_vm1, %v6472_v13 }
  0xff   : > { %4888 = vmatprep.mubr.msk.f32.mxu1 %vm298_vm1, %v6152_v59  ;;  %5112 = vmatprep.mubr.msk.f32.mxu0 %vm298_vm1, %v4309_v18 }
 0x102   : > { %4889 = vmatmul.mubr.msk.f32.gmra.mrb[14].mxu1 %vm298_vm1, %v6907_v3  ;;  %5113 = vmatmul.mubr.msk.f32.gmra.mrb[30].mxu0 %vm298_vm1, %v4310_v23 }
 0x103   : > { %4891 = vmatprep.mubr.msk.f32.mxu1 %vm298_vm1, %v6166_v29  ;;  %5117 = vmatprep.mubr.msk.f32.mxu0 %vm298_vm1, %v5848_v27  ;;  %v6909_v27 = vld [vmem:[#allocation32_spill] sm:$0xff] }
 0x104   : > { %v4375_v29 = vld [vmem:[%s5705_s28 + $0x19a] sm:$0xff] }
 0x106   : > { %4892 = vmatmul.mubr.msk.f32.gmra.mrb[16].mxu1 %vm298_vm1, %v6180_v31  ;;  %5118 = vmatmul.mubr.msk.f32.vlgmr.msra.gmra.mrb[0].mxu0 %vm298_vm1, %v5864_v30  ;;  %v6910_v30 = vld [vmem:[#allocation17_spill] sm:$0xff]  ;;  %v6911_v31 = vld [vmem:[#allocation34_spill] sm:$0xff] }
 0x107   : > { %4894 = vmatprep.mubr.msk.f32.mxu1 %vm298_vm1, %v6185_v0  ;;  %5120 = vmatprep.mubr.msk.f32.mxu0 %vm298_vm1, %v5872_v32  ;;  %v4376_v32 = vld [vmem:[%s5705_s28 + $0x1a2] sm:$0xff]  ;;  %s5499_s28 = scalar_lea.vmem %s6737_s16, 4096 }
 0x108   : > { %p5500_p0 = scmp.ne.s32.totalorder %s6737_s16, %s5499_s28 }
 0x10a   : > { %4895 = vmatmul.mubr.msk.f32.gmra.mrb[18].mxu1 %vm298_vm1, %v6198_v28  ;;  %5121 = vmatmul.mubr.msk.f32.gmra.mrb[2].mxu0 %vm298_vm1, %v5888_v34  ;;  %p5501_p1 = pnand %p5500_p0, %p5669_p3 }
 0x10b   : > { %4897 = vmatprep.mubr.msk.f32.mxu1 %vm298_vm1, %v6201_v5  ;;  %5123 = vmatprep.mubr.msk.f32.mxu0 %vm298_vm1, %v5894_v36 }
 0x10c   : > { %p5502_p2 = pneg %p5501_p1 }
 0x10e   : > { %4898 = vmatmul.mubr.msk.f32.gmra.mrb[20].mxu1 %vm298_vm1, %v6212_v7  ;;  %5124 = vmatmul.mubr.msk.f32.gmra.mrb[4].mxu0 %vm298_vm1, %v5908_v38 }
 0x10f   : > { %4900 = vmatprep.mubr.msk.f32.mxu1 %vm298_vm1, %v6215_v17  ;;  %5126 = vmatprep.mubr.msk.f32.mxu0 %vm298_vm1, %v5914_v40 }
 0x112   : > { %4901 = vmatmul.mubr.msk.f32.gmra.mrb[22].mxu1 %vm298_vm1, %v6226_v57  ;;  %5127 = vmatmul.mubr.msk.f32.gmra.mrb[6].mxu0 %vm298_vm1, %v5928_v42 }
 0x113   : > { %4903 = vmatprep.mubr.msk.f32.mxu1 %vm298_vm1, %v6229_v51  ;;  %5129 = vmatprep.mubr.msk.f32.mxu0 %vm298_vm1, %v5934_v44  ;;  %v6627_v51 = vld [vmem:[%s230_s6] ss:$0 sm:$0xff]  ;;  %s5505_s6 = scalar_lea.vmem %s5504_s5, 8192 }
 0x114   : > { %p5507_p5 = scmp.lt.s32.totalorder %s5505_s6, %s5499_s28 }
 0x116   : > { %4904 = vmatmul.mubr.msk.f32.gmra.mrb[24].mxu1 %vm298_vm1, %v6240_v47  ;;  %5130 = vmatmul.mubr.msk.f32.gmra.mrb[8].mxu0 %vm298_vm1, %v5948_v46  ;;  %p5508_p6 = por %p5507_p5, %p5506_p4 }
 0x117   : > { %4906 = vmatprep.mubr.msk.f32.mxu1 %vm298_vm1, %v6243_v43  ;;  %5132 = vmatprep.mubr.msk.f32.mxu0 %vm298_vm1, %v5954_v48 }
 0x118   : > { %p5509_p7 = pnand %p5508_p6, %p5502_p2 }
 0x11a   : > { %4907 = vmatmul.mubr.msk.f32.gmra.mrb[26].mxu1 %vm298_vm1, %v6254_v39  ;;  %5133 = vmatmul.mubr.msk.f32.gmra.mrb[10].mxu0 %vm298_vm1, %v5968_v50 }
 0x11b   : > { %4909 = vmatprep.mubr.msk.f32.mxu1 %vm298_vm1, %v6257_v35  ;;  %5135 = vmatprep.mubr.msk.f32.mxu0 %vm298_vm1, %v5974_v52 }
 0x11e   : > { %4910 = vmatmul.mubr.msk.f32.gmra.mrb[28].mxu1 %vm298_vm1, %v6268_v62  ;;  %5136 = vmatmul.mubr.msk.f32.gmra.mrb[12].mxu0 %vm298_vm1, %v5988_v54 }
 0x11f   : > { %4912 = vmatprep.mubr.msk.f32.mxu1 %vm298_vm1, %v6323_v24  ;;  %5138 = vmatprep.mubr.msk.f32.mxu0 %vm298_vm1, %v5992_v56 }
 0x122   : > { %4913 = vmatmul.mubr.msk.f32.gmra.mrb[30].mxu1 %vm298_vm1, %v6334_v25  ;;  %5139 = vmatmul.mubr.msk.f32.gmra.mrb[14].mxu0 %vm298_vm1, %v6003_v58 }
 0x123   : > { %4941 = vmatprep.mubr.msk.f32.mxu1 %vm298_vm1, %v5845_v26  ;;  %5141 = vmatprep.mubr.msk.f32.mxu0 %vm298_vm1, %v6009_v60  ;;  %v6908_v26 = vld [vmem:[#allocation30_spill] sm:$0xff] }
 0x126   : > { %4942 = vmatmul.mubr.msk.f32.vlgmr.msra.gmra.mrb[16].mxu1 %vm298_vm1, %v6880_v9  ;;  %5142 = vmatmul.mubr.msk.f32.gmra.mrb[16].mxu0 %vm298_vm1, %v6025_v63 }
 0x127   : > { %4944 = vmatprep.mubr.msk.f32.mxu1 %vm298_vm1, %v6882_v12  ;;  %5144 = vmatprep.mubr.msk.f32.mxu0 %vm298_vm1, %v6033_v2 }
 0x12a   : > { %4945 = vmatmul.mubr.msk.f32.gmra.mrb[18].mxu1 %vm298_vm1, %v6884_v14  ;;  %5145 = vmatmul.mubr.msk.f32.gmra.mrb[18].mxu0 %vm298_vm1, %v6049_v4 }
 0x12b   : > { %4947 = vmatprep.mubr.msk.f32.mxu1 %vm298_vm1, %v6886_v16  ;;  %5147 = vmatprep.mubr.msk.f32.mxu0 %vm298_vm1, %v6055_v6 }
 0x12e   : > { %4948 = vmatmul.mubr.msk.f32.gmra.mrb[20].mxu1 %vm298_vm1, %v6888_v19  ;;  %5148 = vmatmul.mubr.msk.f32.gmra.mrb[20].mxu0 %vm298_vm1, %v6069_v11 }
 0x12f   : > { %4950 = vmatprep.mubr.msk.f32.mxu1 %vm298_vm1, %v6890_v21  ;;  %5150 = vmatprep.mubr.msk.f32.mxu0 %vm298_vm1, %v6075_v55 }
 0x132   : > { %4951 = vmatmul.mubr.msk.f32.gmra.mrb[22].mxu1 %vm298_vm1, %v6892_v22  ;;  %5151 = vmatmul.mubr.msk.f32.gmra.mrb[22].mxu0 %vm298_vm1, %v6089_v53 }
 0x133   : > { %4953 = vmatprep.mubr.msk.f32.mxu1 %vm298_vm1, %v6894_v37  ;;  %5153 = vmatprep.mubr.msk.f32.mxu0 %vm298_vm1, %v6095_v49 }
 0x136   : > { %4954 = vmatmul.mubr.msk.f32.gmra.mrb[24].mxu1 %vm298_vm1, %v6896_v33  ;;  %5154 = vmatmul.mubr.msk.f32.gmra.mrb[24].mxu0 %vm298_vm1, %v6109_v45 }
 0x137   : > { %4956 = vmatprep.mubr.msk.f32.mxu1 %vm298_vm1, %v6898_v10  ;;  %5156 = vmatprep.mubr.msk.f32.mxu0 %vm298_vm1, %v6115_v41 }
 0x13a   : > { %4957 = vmatmul.mubr.msk.f32.gmra.mrb[26].mxu1 %vm298_vm1, %v6900_v15  ;;  %5157 = vmatmul.mubr.msk.f32.gmra.mrb[26].mxu0 %vm298_vm1, %v6908_v26 }
 0x13b   : > { %4959 = vmatprep.mubr.msk.f32.mxu1 %vm298_vm1, %v6902_v20  ;;  %5159 = vmatprep.mubr.msk.f32.mxu0 %vm298_vm1, %v6909_v27 }
 0x13e   : > { %4960 = vmatmul.mubr.msk.f32.gmra.mrb[28].mxu1 %vm298_vm1, %v6910_v30  ;;  %5160 = vmatmul.mubr.msk.f32.gmra.mrb[28].mxu0 %vm298_vm1, %v6911_v31 }
 0x13f   : > { %4962 = vmatprep.mubr.msk.f32.mxu1 %vm298_vm1, %v6461_v1  ;;  %5162 = vmatprep.mubr.msk.f32.mxu0 %vm298_vm1, %v4375_v29 }
 0x142   : > { %4963 = vmatmul.mubr.msk.f32.gmra.mrb[30].mxu1 %vm298_vm1, %v6472_v13  ;;  %5163 = vmatmul.mubr.msk.f32.gmra.mrb[30].mxu0 %vm298_vm1, %v4376_v32 }
 0x1b9   : > { %v4869_v34 = vpop.f32.mrb[0].mxu1 }
 0x1ba   : > { %v1538_v35 = vpop.f32.mrb[1].mxu1 }
 0x1bd   : > { %v4872_v36 = vpop.f32.mrb[2].mxu1 }
 0x1be   : > { %v1548_v38 = vpop.f32.mrb[3].mxu1 }
 0x1c1   : > { %v4875_v39 = vpop.f32.mrb[4].mxu1 }
 0x1c2   : > { %v1558_v40 = vpop.f32.mrb[5].mxu1 }
 0x1c5   : > { %v4878_v41 = vpop.f32.mrb[6].mxu1 }
 0x1c6   : > { %v1568_v42 = vpop.f32.mrb[7].mxu1 }
 0x1c9   : > { %v4881_v43 = vpop.f32.mrb[8].mxu1 }
 0x1ca   : > { %v1578_v44 = vpop.f32.mrb[9].mxu1 }
 0x1cd   : > { %v4884_v45 = vpop.f32.mrb[10].mxu1 }
 0x1ce   : > { %v1588_v46 = vpop.f32.mrb[11].mxu1 }
 0x1d1   : > { %v6614_v47 = vpop.f32.mrb[12].mxu1 }
 0x1d2   : > { %v6616_v48 = vpop.f32.mrb[13].mxu1 }
 0x1d5   : > { %v6618_v49 = vpop.f32.mrb[14].mxu1 }
 0x1d6   : > { %v6624_v50 = vpop.f32.mrb[15].mxu1 }
 0x1d9   : > { %v5119_v52 = vpop.f32.mrb[0].mxu0 }
 0x1da   : > { %v5167_v53 = vadd.f32 %v5119_v52, %v4869_v34  ;;  %v3489_v54 = vpop.f32.mrb[1].mxu0 }
 0x1db   : > { %v5168_v56 = vadd.f32 %v3489_v54, %v1538_v35 }
 0x1dc   : > { %v3688_v58 = vadd.f32 %v5167_v53, %v6627_v51 }
 0x1dd   : > { %v3687_v59 = vadd.f32 %v5168_v56, %v6627_v51  ;;  %v5122_v60 = vpop.f32.mrb[2].mxu0 }
 0x1de   : > { %v3720_v62 = vmax.f32 %v3688_v58, 0.0  ;;  %v5169_v63 = vadd.f32 %v5122_v60, %v4872_v36  ;;  %v3499_v0 = vpop.f32.mrb[3].mxu0 }
 0x1df   : > { %v3719_v2 = vmax.f32 %v3687_v59, 0.0  ;;  %v5170_v4 = vadd.f32 %v3499_v0, %v1548_v38 }
 0x1e0   : > { %3753 = vst.msk [vmem:[%s6633_s4 + $0x8] sm:$0xff] %vm3751_vm2, %v3720_v62  ;;  %v3690_v5 = vadd.f32 %v5169_v63, %v6627_v51 }
 0x1e1   : > { %3752 = vst.msk [vmem:[%s6633_s4] sm:$0xff] %vm3751_vm2, %v3719_v2  ;;  %v3689_v6 = vadd.f32 %v5170_v4, %v6627_v51  ;;  %v5125_v7 = vpop.f32.mrb[4].mxu0 }
 0x1e2   : > { %v3722_v11 = vmax.f32 %v3690_v5, 0.0  ;;  %v5171_v17 = vadd.f32 %v5125_v7, %v4875_v39  ;;  %v3509_v55 = vpop.f32.mrb[5].mxu0 }
 0x1e3   : > { %v3721_v57 = vmax.f32 %v3689_v6, 0.0  ;;  %v5172_v28 = vadd.f32 %v3509_v55, %v1558_v40 }
 0x1e4   : > { %3755 = vst.msk [vmem:[%s6633_s4 + $0x18] sm:$0xff] %vm3751_vm2, %v3722_v11  ;;  %v3692_v24 = vadd.f32 %v5171_v17, %v6627_v51 }
 0x1e5   : > { %3754 = vst.msk [vmem:[%s6633_s4 + $0x10] sm:$0xff] %vm3751_vm2, %v3721_v57  ;;  %v3691_v25 = vadd.f32 %v5172_v28, %v6627_v51  ;;  %v5128_v8 = vpop.f32.mrb[6].mxu0 }
 0x1e6   : > { %v3724_v9 = vmax.f32 %v3692_v24, 0.0  ;;  %v5173_v12 = vadd.f32 %v5128_v8, %v4878_v41  ;;  %v3519_v14 = vpop.f32.mrb[7].mxu0 }
 0x1e7   : > { %v3723_v16 = vmax.f32 %v3691_v25, 0.0  ;;  %v5174_v19 = vadd.f32 %v3519_v14, %v1568_v42 }
 0x1e8   : > { %3757 = vst.msk [vmem:[%s6633_s4 + $0x28] sm:$0xff] %vm3751_vm2, %v3724_v9  ;;  %v3694_v21 = vadd.f32 %v5173_v12, %v6627_v51 }
 0x1e9   : > { %3756 = vst.msk [vmem:[%s6633_s4 + $0x20] sm:$0xff] %vm3751_vm2, %v3723_v16  ;;  %v3693_v22 = vadd.f32 %v5174_v19, %v6627_v51  ;;  %v5131_v37 = vpop.f32.mrb[8].mxu0 }
 0x1ea   : > { %v3726_v33 = vmax.f32 %v3694_v21, 0.0  ;;  %v5175_v10 = vadd.f32 %v5131_v37, %v4881_v43  ;;  %v3529_v15 = vpop.f32.mrb[9].mxu0 }
 0x1eb   : > { %v3725_v20 = vmax.f32 %v3693_v22, 0.0  ;;  %v5176_v1 = vadd.f32 %v3529_v15, %v1578_v44 }
 0x1ec   : > { %3759 = vst.msk [vmem:[%s6633_s4 + $0x38] sm:$0xff] %vm3751_vm2, %v3726_v33  ;;  %v3696_v3 = vadd.f32 %v5175_v10, %v6627_v51 }
 0x1ed   : > { %3758 = vst.msk [vmem:[%s6633_s4 + $0x30] sm:$0xff] %vm3751_vm2, %v3725_v20  ;;  %v3695_v61 = vadd.f32 %v5176_v1, %v6627_v51  ;;  %v5134_v13 = vpop.f32.mrb[10].mxu0 }
 0x1ee   : > { %v3728_v18 = vmax.f32 %v3696_v3, 0.0  ;;  %v5177_v23 = vadd.f32 %v5134_v13, %v4884_v45  ;;  %v3539_v26 = vpop.f32.mrb[11].mxu0 }
 0x1ef   : > { %v3727_v27 = vmax.f32 %v3695_v61, 0.0  ;;  %v5178_v29 = vadd.f32 %v3539_v26, %v1588_v46 }
 0x1f0   : > { %3761 = vst.msk [vmem:[%s6633_s4 + $0x48] sm:$0xff] %vm3751_vm2, %v3728_v18  ;;  %v3698_v30 = vadd.f32 %v5177_v23, %v6627_v51 }
 0x1f1   : > { %3760 = vst.msk [vmem:[%s6633_s4 + $0x40] sm:$0xff] %vm3751_vm2, %v3727_v27  ;;  %v3697_v31 = vadd.f32 %v5178_v29, %v6627_v51  ;;  %v5137_v32 = vpop.f32.mrb[12].mxu0 }
 0x1f2   : > { %v3730_v34 = vmax.f32 %v3698_v30, 0.0  ;;  %v5179_v35 = vadd.f32 %v5137_v32, %v6614_v47  ;;  %v3549_v36 = vpop.f32.mrb[13].mxu0 }
 0x1f3   : > { %v3729_v38 = vmax.f32 %v3697_v31, 0.0  ;;  %v5180_v39 = vadd.f32 %v3549_v36, %v6616_v48 }
 0x1f4   : > { %3763 = vst.msk [vmem:[%s6633_s4 + $0x58] sm:$0xff] %vm3751_vm2, %v3730_v34  ;;  %v3700_v40 = vadd.f32 %v5179_v35, %v6627_v51 }
 0x1f5   : > { %3762 = vst.msk [vmem:[%s6633_s4 + $0x50] sm:$0xff] %vm3751_vm2, %v3729_v38  ;;  %v3699_v41 = vadd.f32 %v5180_v39, %v6627_v51  ;;  %v5140_v42 = vpop.f32.mrb[14].mxu0 }
 0x1f6   : > { %v3732_v43 = vmax.f32 %v3700_v40, 0.0  ;;  %v5181_v44 = vadd.f32 %v5140_v42, %v6618_v49  ;;  %v3559_v45 = vpop.f32.mrb[15].mxu0 }
 0x1f7   : > { %v3731_v46 = vmax.f32 %v3699_v41, 0.0  ;;  %v5182_v47 = vadd.f32 %v3559_v45, %v6624_v50 }
 0x1f8   : > { %3765 = vst.msk [vmem:[%s6633_s4 + $0x68] sm:$0xff] %vm3751_vm2, %v3732_v43  ;;  %v3702_v48 = vadd.f32 %v5181_v44, %v6627_v51 }
 0x1f9   : > { %3764 = vst.msk [vmem:[%s6633_s4 + $0x60] sm:$0xff] %vm3751_vm2, %v3731_v46  ;;  %v3701_v52 = vadd.f32 %v5182_v47, %v6627_v51  ;;  %v4943_v53 = vpop.f32.mrb[16].mxu1  ;;  %v5143_v54 = vpop.f32.mrb[16].mxu0 }
 0x1fa   : > { %v3734_v56 = vmax.f32 %v3702_v48, 0.0  ;;  %v5183_v58 = vadd.f32 %v5143_v54, %v4943_v53  ;;  %v2008_v59 = vpop.f32.mrb[17].mxu1  ;;  %v3569_v49 = vpop.f32.mrb[17].mxu0 }
 0x1fb   : > { %v3733_v60 = vmax.f32 %v3701_v52, 0.0  ;;  %v5184_v62 = vadd.f32 %v3569_v49, %v2008_v59 }
 0x1fc   : > { %3767 = vst.msk [vmem:[%s6633_s4 + $0x78] sm:$0xff] %vm3751_vm2, %v3734_v56  ;;  %v3704_v50 = vadd.f32 %v5183_v58, %v6627_v51 }
 0x1fd   : > { %3766 = vst.msk [vmem:[%s6633_s4 + $0x70] sm:$0xff] %vm3751_vm2, %v3733_v60  ;;  %v3703_v63 = vadd.f32 %v5184_v62, %v6627_v51  ;;  %v4946_v0 = vpop.f32.mrb[18].mxu1  ;;  %v5146_v2 = vpop.f32.mrb[18].mxu0 }
 0x1fe   : > { %v3736_v4 = vmax.f32 %v3704_v50, 0.0  ;;  %v5185_v5 = vadd.f32 %v5146_v2, %v4946_v0  ;;  %v2018_v6 = vpop.f32.mrb[19].mxu1  ;;  %v3579_v7 = vpop.f32.mrb[19].mxu0 }
 0x1ff   : > { %v3735_v11 = vmax.f32 %v3703_v63, 0.0  ;;  %v5186_v17 = vadd.f32 %v3579_v7, %v2018_v6 }
 0x200   : > { %3769 = vst.msk [vmem:[%s6633_s4 + $0x88] sm:$0xff] %vm3751_vm2, %v3736_v4  ;;  %v3706_v55 = vadd.f32 %v5185_v5, %v6627_v51 }
 0x201   : > { %3768 = vst.msk [vmem:[%s6633_s4 + $0x80] sm:$0xff] %vm3751_vm2, %v3735_v11  ;;  %v3705_v57 = vadd.f32 %v5186_v17, %v6627_v51  ;;  %v4949_v28 = vpop.f32.mrb[20].mxu1  ;;  %v5149_v24 = vpop.f32.mrb[20].mxu0 }
 0x202   : > { %v3738_v25 = vmax.f32 %v3706_v55, 0.0  ;;  %v5187_v8 = vadd.f32 %v5149_v24, %v4949_v28  ;;  %v2028_v9 = vpop.f32.mrb[21].mxu1  ;;  %v3589_v12 = vpop.f32.mrb[21].mxu0 }
 0x203   : > { %v3737_v14 = vmax.f32 %v3705_v57, 0.0  ;;  %v5188_v16 = vadd.f32 %v3589_v12, %v2028_v9 }
 0x204   : > { %3771 = vst.msk [vmem:[%s6633_s4 + $0x98] sm:$0xff] %vm3751_vm2, %v3738_v25  ;;  %v3708_v19 = vadd.f32 %v5187_v8, %v6627_v51 }
 0x205   : > { %3770 = vst.msk [vmem:[%s6633_s4 + $0x90] sm:$0xff] %vm3751_vm2, %v3737_v14  ;;  %v3707_v21 = vadd.f32 %v5188_v16, %v6627_v51  ;;  %v4952_v22 = vpop.f32.mrb[22].mxu1  ;;  %v5152_v37 = vpop.f32.mrb[22].mxu0 }
 0x206   : > { %v3740_v33 = vmax.f32 %v3708_v19, 0.0  ;;  %v5189_v10 = vadd.f32 %v5152_v37, %v4952_v22  ;;  %v2038_v15 = vpop.f32.mrb[23].mxu1  ;;  %v3599_v20 = vpop.f32.mrb[23].mxu0 }
 0x207   : > { %v3739_v1 = vmax.f32 %v3707_v21, 0.0  ;;  %v5190_v3 = vadd.f32 %v3599_v20, %v2038_v15 }
 0x208   : > { %3773 = vst.msk [vmem:[%s6633_s4 + $0xa8] sm:$0xff] %vm3751_vm2, %v3740_v33  ;;  %v3710_v61 = vadd.f32 %v5189_v10, %v6627_v51 }
 0x209   : > { %3772 = vst.msk [vmem:[%s6633_s4 + $0xa0] sm:$0xff] %vm3751_vm2, %v3739_v1  ;;  %v3709_v13 = vadd.f32 %v5190_v3, %v6627_v51  ;;  %v4955_v18 = vpop.f32.mrb[24].mxu1  ;;  %v5155_v23 = vpop.f32.mrb[24].mxu0 }
 0x20a   : > { %v3742_v26 = vmax.f32 %v3710_v61, 0.0  ;;  %v5191_v27 = vadd.f32 %v5155_v23, %v4955_v18  ;;  %v2048_v29 = vpop.f32.mrb[25].mxu1  ;;  %v3609_v30 = vpop.f32.mrb[25].mxu0 }
 0x20b   : > { %v3741_v31 = vmax.f32 %v3709_v13, 0.0  ;;  %v5192_v32 = vadd.f32 %v3609_v30, %v2048_v29 }
 0x20c   : > { %3775 = vst.msk [vmem:[%s6633_s4 + $0xb8] sm:$0xff] %vm3751_vm2, %v3742_v26  ;;  %v3712_v34 = vadd.f32 %v5191_v27, %v6627_v51 }
 0x20d   : > { %3774 = vst.msk [vmem:[%s6633_s4 + $0xb0] sm:$0xff] %vm3751_vm2, %v3741_v31  ;;  %v3711_v35 = vadd.f32 %v5192_v32, %v6627_v51  ;;  %v4958_v36 = vpop.f32.mrb[26].mxu1  ;;  %v5158_v38 = vpop.f32.mrb[26].mxu0 }
 0x20e   : > { %v3744_v39 = vmax.f32 %v3712_v34, 0.0  ;;  %v5193_v40 = vadd.f32 %v5158_v38, %v4958_v36  ;;  %v2058_v41 = vpop.f32.mrb[27].mxu1  ;;  %v3619_v42 = vpop.f32.mrb[27].mxu0 }
 0x20f   : > { %v3743_v43 = vmax.f32 %v3711_v35, 0.0  ;;  %v5194_v44 = vadd.f32 %v3619_v42, %v2058_v41 }
 0x210   : > { %3777 = vst.msk [vmem:[%s6633_s4 + $0xc8] sm:$0xff] %vm3751_vm2, %v3744_v39  ;;  %v3714_v45 = vadd.f32 %v5193_v40, %v6627_v51 }
 0x211   : > { %3776 = vst.msk [vmem:[%s6633_s4 + $0xc0] sm:$0xff] %vm3751_vm2, %v3743_v43  ;;  %v3713_v46 = vadd.f32 %v5194_v44, %v6627_v51  ;;  %v4961_v47 = vpop.f32.mrb[28].mxu1  ;;  %v5161_v48 = vpop.f32.mrb[28].mxu0 }
 0x212   : > { %v3746_v52 = vmax.f32 %v3714_v45, 0.0  ;;  %v5195_v53 = vadd.f32 %v5161_v48, %v4961_v47  ;;  %v2068_v54 = vpop.f32.mrb[29].mxu1  ;;  %v3629_v56 = vpop.f32.mrb[29].mxu0 }
 0x213   : > { %v3745_v58 = vmax.f32 %v3713_v46, 0.0  ;;  %v5196_v59 = vadd.f32 %v3629_v56, %v2068_v54 }
 0x214   : > { %3779 = vst.msk [vmem:[%s6633_s4 + $0xd8] sm:$0xff] %vm3751_vm2, %v3746_v52  ;;  %v3716_v49 = vadd.f32 %v5195_v53, %v6627_v51 }
 0x215   : > { %3778 = vst.msk [vmem:[%s6633_s4 + $0xd0] sm:$0xff] %vm3751_vm2, %v3745_v58  ;;  %v3715_v60 = vadd.f32 %v5196_v59, %v6627_v51  ;;  %v4964_v62 = vpop.f32.mrb[30].mxu1  ;;  %v5164_v50 = vpop.f32.mrb[30].mxu0 }
 0x216   : > { %v3748_v63 = vmax.f32 %v3716_v49, 0.0  ;;  %v5197_v0 = vadd.f32 %v5164_v50, %v4964_v62  ;;  %v2078_v2 = vpop.f32.mrb[31].mxu1  ;;  %v3639_v4 = vpop.f32.mrb[31].mxu0 }
 0x217   : > { %v3747_v5 = vmax.f32 %v3715_v60, 0.0  ;;  %v5198_v6 = vadd.f32 %v3639_v4, %v2078_v2 }
 0x218   : > { %3781 = vst.msk [vmem:[%s6633_s4 + $0xe8] sm:$0xff] %vm3751_vm2, %v3748_v63  ;;  %v3718_v7 = vadd.f32 %v5197_v0, %v6627_v51 }
 0x219   : > { %3780 = vst.msk [vmem:[%s6633_s4 + $0xe0] sm:$0xff] %vm3751_vm2, %v3747_v5  ;;  %v3717_v11 = vadd.f32 %v5198_v6, %v6627_v51 }
 0x21a   : > { %v3750_v17 = vmax.f32 %v3718_v7, 0.0 }
 0x21b   : > { %v3749_v55 = vmax.f32 %v3717_v11, 0.0 }
 0x21c   : > { %3783 = vst.msk [vmem:[%s6633_s4 + $0xf8] sm:$0xff] %vm3751_vm2, %v3750_v17 }
 0x21d   : > { %3782 = vst.msk [vmem:[%s6633_s4 + $0xf0] sm:$0xff] %vm3751_vm2, %v3749_v55 }
 0x21e   : > { %5512 = shalt.err (!%p5509_p7)
}
 0x21f   : > { %s5513_s7 = scalar_lea.hbm %s6735_s24, 4096  ;;  %s5517_s9 = scalar_lea.hbm %s6800_s3, 40960 }
 0x220   : > { %p5514_p9 = scmp.ne.s32.totalorder %s6735_s24, %s5513_s7  ;;  %p5518_p12 = scmp.lt.u32.totalorder %s6735_s24, %s6800_s3 }
 0x221   : > { %p5519_p13 = scmp.lt.u32.totalorder %s5517_s9, %s5513_s7  ;;  %p5521_p1 = scmp.lt.u32.totalorder %s5513_s7, %s6735_s24 }
 0x222   : > { %p5515_p10 = pnand %p5514_p9, %p5669_p3 }
 0x223   : > { %p5520_p0 = por %p5519_p13, %p5518_p12 }
 0x224   : > { %p5516_p11 = pneg %p5515_p10 }
 0x225   : > { %p5522_p2 = por %p5521_p1, %p5520_p0 }
 0x227   : > { %p5523_p4 = pnand %p5522_p2, %p5516_p11 }
 0x229   : > { %5526 = shalt.err (!%p5523_p4)
}
 0x22a   : > { %s5596_s15 = smov 128   ;;  %s5597_s20 = smov 8  }
 0x22b   : > { %5426 = dma.vmem_to_hbm [thread:$0]  (%p5669_p3), %s6737_s16, 4096, %s6735_s24, %s6745_s27, %s5596_s15, %s5596_s15, %s5597_s20  }
 0x22c PF: > { %p5432_p5 = scmp.ge.s32.totalorder %s5593_s19, 2  ;;  %s3815_s21 = sand.u32 1, %s5565_s12  }
 0x22d   : > { %s3816_s28 = scalar_lea.sflag [#allocation3], %s3815_s21 }
 0x22e   : > { %p5429_p6 = pnand %p5432_p5, %p5678_p8 }
 0x230   : > { %5560 = dma.done.wait (!%p5429_p6), %s3816_s28, 4096  }
 0x231   : > { %5562 = vsyncadd (!%p5429_p6), %s3816_s28, 4294963200  ;;  %s16_s19 = sadd.s32 1, %s5593_s19   ;;  %s6912_s12 = smov %s5569_s13 }
 0x232   : > { %p13_p7 = scmp.ge.s32.totalorder %s16_s19, 12   ;;  %s6913_s13 = smov %s5573_s14 }
 0x233   : > { %s6914_s14 = smov %s5687_s30  ;;  %s6915_s15 = smov %s5585_s17 }
 0x234   : > { %s6916_s16 = smov %s5589_s18  ;;  %s6917_s17 = smov %s6920_s22 }
 0x235   : > { %s6918_s18 = smov %s6924_s23  ;;  %15 = sbr.rel (!%p13_p7) target bundleno = 5 (0x5), region = 83 }
 0x23c   :  { %3821 = vsyncpa [#allocation3], 1 }
 0x23d   :  { %3823 = vsyncpa [#allocation3 + $0x1], 1 }

</bundles_post_ra>
